<compile_context>
chip_gen: v6e
topology: v6e:2x2x1
jax: 0.10.0
libtpu: 0.0.40
codegen_flags: <defaults>
</compile_context>

<pallas_src>
import functools
import math

import jax
import jax.numpy as jnp
from jax.experimental import pallas as pl
from jax.experimental.pallas import tpu as pltpu


# ----------------------------------------------------------------------------
# Fused Pallas kernels
# ----------------------------------------------------------------------------

def _ln(x, g, b, eps):
    mu = jnp.mean(x, axis=-1, keepdims=True)
    var = jnp.mean((x - mu) ** 2, axis=-1, keepdims=True)
    return (x - mu) * jax.lax.rsqrt(var + eps) * g + b


def _news_encoder_kernel(emb_ref, mb_ref,
                         eg_ref, ebn_ref,
                         wqkv_ref, bqkv_ref, wo_ref, bo_ref,
                         ln1g_ref, ln1b_ref, wi_ref, bi_ref,
                         wo2_ref, bo2_ref, ln2g_ref, ln2b_ref,
                         aw1_ref, ab1_ref, aw2_ref, ab2_ref,
                         dw_ref, db_ref,
                         o_ref, *, num_layers, num_heads, eps):
    # One grid step == one news item: mini-BERT + att-pooling + dense, fused.
    x = emb_ref[0]                                    # (S, H)
    h = _ln(x, eg_ref[...], ebn_ref[...], eps)
    mb = mb_ref[0]                                    # (1, S) additive mask bias

    H = h.shape[-1]
    dk = H // num_heads
    scale = 1.0 / math.sqrt(dk)
    inv_sqrt2 = 1.0 / math.sqrt(2.0)

    for l in range(num_layers):                       # static unroll (2 layers)
        # fused QKV projection: (S, 3H)
        qkv = jnp.dot(h, wqkv_ref[l], preferred_element_type=jnp.float32) + bqkv_ref[l]
        wo_l = wo_ref[l]                              # (H, H)

        # per-head attention; concat-then-Wo rewritten as sum_h ctx_h @ Wo_h
        acc = None
        for hd in range(num_heads):                   # static unroll (2 heads)
            q = qkv[:, hd * dk:(hd + 1) * dk]
            k = qkv[:, H + hd * dk:H + (hd + 1) * dk]
            v = qkv[:, 2 * H + hd * dk:2 * H + (hd + 1) * dk]
            s = jnp.dot(q, k.T, preferred_element_type=jnp.float32) * scale + mb
            s = s - jnp.max(s, axis=-1, keepdims=True)
            p = jnp.exp(s)
            p = p * pl.reciprocal(jnp.sum(p, axis=-1, keepdims=True), approx=True)
            ctx_h = jnp.dot(p, v, preferred_element_type=jnp.float32)       # (S, dk)
            contrib = jnp.dot(ctx_h, wo_l[hd * dk:(hd + 1) * dk, :],
                              preferred_element_type=jnp.float32)           # (S, H)
            acc = contrib if acc is None else acc + contrib

        attn_out = acc + bo_ref[l]
        h1 = _ln(attn_out + h, ln1g_ref[l], ln1b_ref[l], eps)

        inter = jnp.dot(h1, wi_ref[l], preferred_element_type=jnp.float32) + bi_ref[l]
        inter = 0.5 * inter * (1.0 + jax.lax.erf(inter * inv_sqrt2))         # exact GELU
        ffn = jnp.dot(inter, wo2_ref[l], preferred_element_type=jnp.float32) + bo2_ref[l]
        h = _ln(ffn + h1, ln2g_ref[l], ln2b_ref[l], eps)

    # AttentionPooling (no mask) + dense to news_dim
    e = jnp.tanh(jnp.dot(h, aw1_ref[...], preferred_element_type=jnp.float32)
                 + ab1_ref[...])                                             # (S, qdim)
    alpha = jnp.exp(jnp.sum(e * aw2_ref[...], axis=-1, keepdims=True) + ab2_ref[...])
    alpha = alpha * pl.reciprocal(jnp.sum(alpha, axis=0, keepdims=True) + 1e-8,
                                  approx=True)                               # (S, 1)
    pooled = jnp.sum(h * alpha, axis=0, keepdims=True)                       # (1, H)
    news = jnp.dot(pooled, dw_ref[...], preferred_element_type=jnp.float32) + db_ref[...]
    o_ref[0] = news                                                          # (1, news_dim)


def _user_encoder_kernel(x_ref, m_ref, pad_ref,
                         wqkv_ref, bqkv_ref,
                         aw1_ref, ab1_ref, aw2_ref, ab2_ref,
                         o_ref, *, n_heads, d_k, d_v):
    # One grid step == one user: pad-doc mix + NRMS MHSA + att-pooling, fused.
    x = x_ref[0]                                      # (L, D)
    m = m_ref[0]                                      # (L, 1)
    x = x * m + pad_ref[...] * (1.0 - m)

    qkv = jnp.dot(x, wqkv_ref[...], preferred_element_type=jnp.float32) + bqkv_ref[...]
    qk_dim = n_heads * d_k
    scale = 1.0 / math.sqrt(d_k)

    ctx_heads = []
    for hd in range(n_heads):                         # static unroll
        q = qkv[:, hd * d_k:(hd + 1) * d_k]
        k = qkv[:, qk_dim + hd * d_k:qk_dim + (hd + 1) * d_k]
        v = qkv[:, 2 * qk_dim + hd * d_v:2 * qk_dim + (hd + 1) * d_v]
        # ScaledDotProductAttention: exp-normalized, eps 1e-8, no mask, no max-shift
        # (matches the PyTorch reference exactly)
        s = jnp.exp(jnp.dot(q, k.T, preferred_element_type=jnp.float32) * scale)
        attn = s * pl.reciprocal(jnp.sum(s, axis=-1, keepdims=True) + 1e-8, approx=True)
        ctx_heads.append(jnp.dot(attn, v, preferred_element_type=jnp.float32))
    ctx = jnp.concatenate(ctx_heads, axis=-1)         # (L, nH*dv)

    # AttentionPooling (no mask)
    e = jnp.tanh(jnp.dot(ctx, aw1_ref[...], preferred_element_type=jnp.float32)
                 + ab1_ref[...])
    alpha = jnp.exp(jnp.sum(e * aw2_ref[...], axis=-1, keepdims=True) + ab2_ref[...])
    alpha = alpha * pl.reciprocal(jnp.sum(alpha, axis=0, keepdims=True) + 1e-8,
                                  approx=True)
    user = jnp.sum(ctx * alpha, axis=0, keepdims=True)                       # (1, nH*dv)
    o_ref[0] = user


# ----------------------------------------------------------------------------
# Pallas wrappers
# ----------------------------------------------------------------------------

def _bcast_spec(arr):
    """Full-array block broadcast to every grid step (weight stays in VMEM)."""
    zeros = (0,) * arr.ndim
    return pl.BlockSpec(arr.shape, lambda i, _z=zeros: _z)


def news_encoder(p, x):
    """x: (N, num_word_title*2) int32 -> (N, news_dim). One pallas_call."""
    N = x.shape[0]
    nw = x.shape[1] // 2
    ids = x[:, :nw]
    attmask = x[:, nw:].astype(jnp.float32)

    bert = p["bert"]
    H = bert["word_emb"].shape[1]
    S = nw

    # Embedding gather + additive sums stay in XLA (data-dependent gather).
    emb = (jnp.take(bert["word_emb"], ids, axis=0)
           + bert["pos_emb"][None, :S, :]
           + bert["type_emb"][0][None, None, :])                            # (N, S, H)
    mask_bias = ((1.0 - attmask) * -10000.0).reshape(N, 1, S)

    weights = [
        bert["emb_ln_g"], bert["emb_ln_b"],
        bert["wqkv"], bert["bqkv"], bert["wo"], bert["bo"],
        bert["ln1_g"], bert["ln1_b"], bert["wi"], bert["bi"],
        bert["wo2"], bert["bo2"], bert["ln2_g"], bert["ln2_b"],
        p["attn_w1"], p["attn_b1"], p["attn_w2"], p["attn_b2"],
        p["dense_w"], p["dense_b"],
    ]
    news_dim = p["dense_w"].shape[1]

    out = pl.pallas_call(
        functools.partial(_news_encoder_kernel,
                          num_layers=bert["num_layers"],
                          num_heads=bert["num_heads"],
                          eps=1e-12),
        out_shape=jax.ShapeDtypeStruct((N, 1, news_dim), jnp.float32),
        grid=(N,),
        in_specs=[
            pl.BlockSpec((1, S, H), lambda i: (i, 0, 0)),
            pl.BlockSpec((1, 1, S), lambda i: (i, 0, 0)),
        ] + [_bcast_spec(w) for w in weights],
        out_specs=pl.BlockSpec((1, 1, news_dim), lambda i: (i, 0, 0)),
        compiler_params=pltpu.CompilerParams(dimension_semantics=("parallel",)),
    )(emb, mask_bias, *weights)
    return out[:, 0, :]


def user_encoder(p, news_vecs, log_mask):
    """NRMS user encoder, user_log_mask == False branch. One pallas_call."""
    B, L, D = news_vecs.shape
    m = log_mask.reshape(B, L, 1).astype(jnp.float32)
    nH, dk, dv = p["n_heads"], 16, 16
    out_dim = nH * dv

    weights = [p["pad_doc"], p["wqkv"], p["bqkv"],
               p["uattn_w1"], p["uattn_b1"], p["uattn_w2"], p["uattn_b2"]]

    out = pl.pallas_call(
        functools.partial(_user_encoder_kernel, n_heads=nH, d_k=dk, d_v=dv),
        out_shape=jax.ShapeDtypeStruct((B, 1, out_dim), jnp.float32),
        grid=(B,),
        in_specs=[
            pl.BlockSpec((1, L, D), lambda i: (i, 0, 0)),
            pl.BlockSpec((1, L, 1), lambda i: (i, 0, 0)),
        ] + [_bcast_spec(w) for w in weights],
        out_specs=pl.BlockSpec((1, 1, out_dim), lambda i: (i, 0, 0)),
        compiler_params=pltpu.CompilerParams(dimension_semantics=("parallel",)),
    )(news_vecs, m, *weights)
    return out[:, 0, :]


# ----------------------------------------------------------------------------
# Full model forward (JAX glue composing the two fused kernels)
# ----------------------------------------------------------------------------

def model_bert_forward(params, history, history_mask, candidate):
    B = history.shape[0]
    L = history.shape[1]
    C = candidate.shape[1]
    input_id_num = history.shape[-1]

    candidate_news = candidate.reshape(-1, input_id_num)
    history_news = history.reshape(-1, input_id_num)

    # Encode candidate + history news in ONE pass (better row occupancy,
    # half the launches), then split.
    all_news = jnp.concatenate([candidate_news, history_news], axis=0)
    all_vecs = news_encoder(params["news"], all_news)
    news_dim = all_vecs.shape[-1]
    candidate_news_vecs = all_vecs[:B * C].reshape(B, C, news_dim)
    history_news_vecs = all_vecs[B * C:].reshape(B, L, news_dim)

    user_vec = user_encoder(params["user"], history_news_vecs, history_mask)

    # Tiny (B,C,D)x(B,D) dot: launch overhead >> compute, leave to XLA.
    score = jnp.einsum("bcd,bd->bc", candidate_news_vecs, user_vec)
    return score, history_news_vecs, candidate_news_vecs, user_vec


# ----------------------------------------------------------------------------
# Deterministic parameter init (random mini-BERT stand-in for the checkpoint)
# ----------------------------------------------------------------------------

def init_params(key, *, vocab=64, hidden=32, num_layers=2, num_heads=2,
                intermediate=64, max_pos=16, news_dim=32,
                news_qdim=16, user_qdim=16, nrms_heads=2):
    keys = iter(jax.random.split(key, 256))

    def w(shape, scale=0.05):
        return jax.random.normal(next(keys), shape, jnp.float32) * scale

    def dense(din, dout):
        return w((din, dout)), w((1, dout), 0.01)

    # Per-layer weights, QKV fused and stacked along a leading layer axis so
    # the whole encoder is a single kernel.
    wqkv_l, bqkv_l, wo_l, bo_l = [], [], [], []
    wi_l, bi_l, wo2_l, bo2_l = [], [], [], []
    ln1g_l, ln1b_l, ln2g_l, ln2b_l = [], [], [], []
    for _ in range(num_layers):
        wq, bq = dense(hidden, hidden)
        wk, bk = dense(hidden, hidden)
        wv, bv = dense(hidden, hidden)
        wqkv_l.append(jnp.concatenate([wq, wk, wv], axis=1))      # (H, 3H)
        bqkv_l.append(jnp.concatenate([bq, bk, bv], axis=1))      # (1, 3H)
        wo, bo = dense(hidden, hidden)
        wi, bi = dense(hidden, intermediate)
        wo2, bo2 = dense(intermediate, hidden)
        wo_l.append(wo); bo_l.append(bo)
        wi_l.append(wi); bi_l.append(bi)
        wo2_l.append(wo2); bo2_l.append(bo2)
        ln1g_l.append(jnp.ones((1, hidden), jnp.float32))
        ln1b_l.append(jnp.zeros((1, hidden), jnp.float32))
        ln2g_l.append(jnp.ones((1, hidden), jnp.float32))
        ln2b_l.append(jnp.zeros((1, hidden), jnp.float32))

    bert = dict(
        hidden=hidden, num_heads=num_heads, num_layers=num_layers,
        word_emb=w((vocab, hidden), 0.02),
        pos_emb=w((max_pos, hidden), 0.02),
        type_emb=w((2, hidden), 0.02),   # token_type_ids assumed all-zero (index 0)
        emb_ln_g=jnp.ones((1, hidden), jnp.float32),
        emb_ln_b=jnp.zeros((1, hidden), jnp.float32),
        wqkv=jnp.stack(wqkv_l), bqkv=jnp.stack(bqkv_l),
        wo=jnp.stack(wo_l), bo=jnp.stack(bo_l),
        wi=jnp.stack(wi_l), bi=jnp.stack(bi_l),
        wo2=jnp.stack(wo2_l), bo2=jnp.stack(bo2_l),
        ln1_g=jnp.stack(ln1g_l), ln1_b=jnp.stack(ln1b_l),
        ln2_g=jnp.stack(ln2g_l), ln2_b=jnp.stack(ln2b_l),
    )

    attn_w1, attn_b1 = dense(hidden, news_qdim)
    dense_w, dense_b = dense(hidden, news_dim)
    news = dict(
        bert=bert,
        attn_w1=attn_w1, attn_b1=attn_b1,
        attn_w2=w((1, news_qdim)), attn_b2=w((1, 1), 0.01),
        dense_w=dense_w, dense_b=dense_b,
    )

    dqk = nrms_heads * 16
    uwq, ubq = dense(news_dim, dqk)
    uwk, ubk = dense(news_dim, dqk)
    uwv, ubv = dense(news_dim, dqk)
    uattn_w1, uattn_b1 = dense(dqk, user_qdim)
    user = dict(
        n_heads=nrms_heads,
        pad_doc=jax.random.uniform(next(keys), (1, news_dim), jnp.float32, -1.0, 1.0),
        wqkv=jnp.concatenate([uwq, uwk, uwv], axis=1),            # (D, 3*nH*16)
        bqkv=jnp.concatenate([ubq, ubk, ubv], axis=1),            # (1, 3*nH*16)
        uattn_w1=uattn_w1, uattn_b1=uattn_b1,
        uattn_w2=w((1, user_qdim)), uattn_b2=w((1, 1), 0.01),
    )

    return dict(news=news, user=user)


# ----------------------------------------------------------------------------
# Main
# ----------------------------------------------------------------------------

if __name__ == "__main__":
    key = jax.random.PRNGKey(0)
    pkey, k1, k2 = jax.random.split(key, 3)

    B = 2        # batch
    L = 4        # user_log_length / history length
    C = 3        # 1 + K candidates
    NW = 8       # num_word_title
    VOCAB = 64
    NEWS_DIM = 32

    params = init_params(pkey, vocab=VOCAB, news_dim=NEWS_DIM)

    hist_ids = jax.random.randint(k1, (B, L, NW), 1, VOCAB, dtype=jnp.int32)
    cand_ids = jax.random.randint(k2, (B, C, NW), 1, VOCAB, dtype=jnp.int32)
    token_mask = (jnp.arange(NW) < 6).astype(jnp.int32)
    hist_tok_mask = jnp.broadcast_to(token_mask, (B, L, NW))
    cand_tok_mask = jnp.broadcast_to(token_mask, (B, C, NW))

    history = jnp.concatenate([hist_ids, hist_tok_mask], axis=-1)    # (B, L, 2*NW)
    candidate = jnp.concatenate([cand_ids, cand_tok_mask], axis=-1)  # (B, C, 2*NW)
    history_mask = jnp.array([[1, 1, 1, 0], [1, 1, 0, 0]], jnp.float32)

    # Params are bound as compile-time constants (tiny model); only data is traced.
    forward = jax.jit(functools.partial(model_bert_forward, params))

    score, hist_vecs, cand_vecs, user_vec = forward(history, history_mask, candidate)
    jax.block_until_ready((score, hist_vecs, cand_vecs, user_vec))

    assert score.shape == (B, C)
    assert hist_vecs.shape == (B, L, NEWS_DIM)
    assert cand_vecs.shape == (B, C, NEWS_DIM)
    assert user_vec.shape == (B, NEWS_DIM)
    assert bool(jnp.all(jnp.isfinite(score)))
    assert bool(jnp.all(jnp.isfinite(user_vec)))

    print("KERNEL_OK")
</pallas_src>

<mosaic_0001>
module attributes {stable_mosaic.version = 11 : i64} {
  func.func @_news_encoder_kernel(%arg0: i32, %arg1: memref<1x8x32xf32, #tpu.memory_space<vmem>>, %arg2: memref<1x1x8xf32, #tpu.memory_space<vmem>>, %arg3: memref<1x32xf32, #tpu.memory_space<vmem>>, %arg4: memref<1x32xf32, #tpu.memory_space<vmem>>, %arg5: memref<2x32x96xf32, #tpu.memory_space<vmem>>, %arg6: memref<2x1x96xf32, #tpu.memory_space<vmem>>, %arg7: memref<2x32x32xf32, #tpu.memory_space<vmem>>, %arg8: memref<2x1x32xf32, #tpu.memory_space<vmem>>, %arg9: memref<2x1x32xf32, #tpu.memory_space<vmem>>, %arg10: memref<2x1x32xf32, #tpu.memory_space<vmem>>, %arg11: memref<2x32x64xf32, #tpu.memory_space<vmem>>, %arg12: memref<2x1x64xf32, #tpu.memory_space<vmem>>, %arg13: memref<2x64x32xf32, #tpu.memory_space<vmem>>, %arg14: memref<2x1x32xf32, #tpu.memory_space<vmem>>, %arg15: memref<2x1x32xf32, #tpu.memory_space<vmem>>, %arg16: memref<2x1x32xf32, #tpu.memory_space<vmem>>, %arg17: memref<32x16xf32, #tpu.memory_space<vmem>>, %arg18: memref<1x16xf32, #tpu.memory_space<vmem>>, %arg19: memref<1x16xf32, #tpu.memory_space<vmem>>, %arg20: memref<1x1xf32, #tpu.memory_space<vmem>>, %arg21: memref<32x32xf32, #tpu.memory_space<vmem>>, %arg22: memref<1x32xf32, #tpu.memory_space<vmem>>, %arg23: memref<1x1x32xf32, #tpu.memory_space<vmem>>) attributes {dimension_semantics = [#tpu.dimension_semantics<parallel>], iteration_bounds = array<i64: 14>, scalar_prefetch = 0 : i64, scratch_operands = 0 : i64, tpu.core_type = #tpu.core_type<tc>, window_params = [{transform_indices = @transform_0, window_bounds = array<i64: 1, 8, 32>}, {transform_indices = @transform_1, window_bounds = array<i64: 1, 1, 8>}, {pipeline_mode = #tpu.pipeline_mode<synchronous>, transform_indices = @transform_2, window_bounds = array<i64: 1, 32>}, {pipeline_mode = #tpu.pipeline_mode<synchronous>, transform_indices = @transform_3, window_bounds = array<i64: 1, 32>}, {pipeline_mode = #tpu.pipeline_mode<synchronous>, transform_indices = @transform_4, window_bounds = array<i64: 2, 32, 96>}, {pipeline_mode = #tpu.pipeline_mode<synchronous>, transform_indices = @transform_5, window_bounds = array<i64: 2, 1, 96>}, {pipeline_mode = #tpu.pipeline_mode<synchronous>, transform_indices = @transform_6, window_bounds = array<i64: 2, 32, 32>}, {pipeline_mode = #tpu.pipeline_mode<synchronous>, transform_indices = @transform_7, window_bounds = array<i64: 2, 1, 32>}, {pipeline_mode = #tpu.pipeline_mode<synchronous>, transform_indices = @transform_8, window_bounds = array<i64: 2, 1, 32>}, {pipeline_mode = #tpu.pipeline_mode<synchronous>, transform_indices = @transform_9, window_bounds = array<i64: 2, 1, 32>}, {pipeline_mode = #tpu.pipeline_mode<synchronous>, transform_indices = @transform_10, window_bounds = array<i64: 2, 32, 64>}, {pipeline_mode = #tpu.pipeline_mode<synchronous>, transform_indices = @transform_11, window_bounds = array<i64: 2, 1, 64>}, {pipeline_mode = #tpu.pipeline_mode<synchronous>, transform_indices = @transform_12, window_bounds = array<i64: 2, 64, 32>}, {pipeline_mode = #tpu.pipeline_mode<synchronous>, transform_indices = @transform_13, window_bounds = array<i64: 2, 1, 32>}, {pipeline_mode = #tpu.pipeline_mode<synchronous>, transform_indices = @transform_14, window_bounds = array<i64: 2, 1, 32>}, {pipeline_mode = #tpu.pipeline_mode<synchronous>, transform_indices = @transform_15, window_bounds = array<i64: 2, 1, 32>}, {pipeline_mode = #tpu.pipeline_mode<synchronous>, transform_indices = @transform_16, window_bounds = array<i64: 32, 16>}, {pipeline_mode = #tpu.pipeline_mode<synchronous>, transform_indices = @transform_17, window_bounds = array<i64: 1, 16>}, {pipeline_mode = #tpu.pipeline_mode<synchronous>, transform_indices = @transform_18, window_bounds = array<i64: 1, 16>}, {pipeline_mode = #tpu.pipeline_mode<synchronous>, transform_indices = @transform_19, window_bounds = array<i64: 1, 1>}, {pipeline_mode = #tpu.pipeline_mode<synchronous>, transform_indices = @transform_20, window_bounds = array<i64: 32, 32>}, {pipeline_mode = #tpu.pipeline_mode<synchronous>, transform_indices = @transform_21, window_bounds = array<i64: 1, 32>}, {transform_indices = @transform_22, window_bounds = array<i64: 1, 1, 32>}]} {
    %c0 = arith.constant 0 : index
    %c0_0 = arith.constant 0 : index
    %c0_1 = arith.constant 0 : index
    %0 = vector.load %arg1[%c0, %c0_0, %c0_1] : memref<1x8x32xf32, #tpu.memory_space<vmem>>, vector<1x8x32xf32>
    %1 = vector.shape_cast %0 : vector<1x8x32xf32> to vector<8x32xf32>
    %c0_2 = arith.constant 0 : index
    %c0_3 = arith.constant 0 : index
    %2 = vector.load %arg3[%c0_2, %c0_3] : memref<1x32xf32, #tpu.memory_space<vmem>>, vector<1x32xf32>
    %c0_4 = arith.constant 0 : index
    %c0_5 = arith.constant 0 : index
    %3 = vector.load %arg4[%c0_4, %c0_5] : memref<1x32xf32, #tpu.memory_space<vmem>>, vector<1x32xf32>
    %cst = arith.constant dense<0.000000e+00> : vector<8xf32>
    %4 = vector.multi_reduction <add>, %1, %cst [1] : vector<8x32xf32> to vector<8xf32>
    %5 = vector.shape_cast %4 : vector<8xf32> to vector<8x1xf32>
    %cst_6 = arith.constant 3.200000e+01 : f32
    %6 = vector.broadcast %cst_6 : f32 to vector<8x1xf32>
    %7 = arith.divf %5, %6 : vector<8x1xf32>
    %8 = vector.broadcast %7 : vector<8x1xf32> to vector<8x32xf32>
    %9 = arith.subf %1, %8 : vector<8x32xf32>
    %10 = arith.mulf %9, %9 : vector<8x32xf32>
    %cst_7 = arith.constant dense<0.000000e+00> : vector<8xf32>
    %11 = vector.multi_reduction <add>, %10, %cst_7 [1] : vector<8x32xf32> to vector<8xf32>
    %12 = vector.shape_cast %11 : vector<8xf32> to vector<8x1xf32>
    %cst_8 = arith.constant 3.200000e+01 : f32
    %13 = vector.broadcast %cst_8 : f32 to vector<8x1xf32>
    %14 = arith.divf %12, %13 : vector<8x1xf32>
    %15 = vector.broadcast %7 : vector<8x1xf32> to vector<8x32xf32>
    %16 = arith.subf %1, %15 : vector<8x32xf32>
    %cst_9 = arith.constant 9.99999996E-13 : f32
    %17 = vector.broadcast %cst_9 : f32 to vector<8x1xf32>
    %18 = arith.addf %14, %17 : vector<8x1xf32>
    %19 = math.rsqrt %18 : vector<8x1xf32>
    %20 = vector.broadcast %19 : vector<8x1xf32> to vector<8x32xf32>
    %21 = arith.mulf %16, %20 : vector<8x32xf32>
    %22 = vector.broadcast %2 : vector<1x32xf32> to vector<8x32xf32>
    %23 = arith.mulf %21, %22 : vector<8x32xf32>
    %24 = vector.broadcast %3 : vector<1x32xf32> to vector<8x32xf32>
    %25 = arith.addf %23, %24 : vector<8x32xf32>
    %c0_10 = arith.constant 0 : index
    %c0_11 = arith.constant 0 : index
    %c0_12 = arith.constant 0 : index
    %26 = vector.load %arg2[%c0_10, %c0_11, %c0_12] : memref<1x1x8xf32, #tpu.memory_space<vmem>>, vector<1x1x8xf32>
    %27 = vector.shape_cast %26 : vector<1x1x8xf32> to vector<1x8xf32>
    %c0_13 = arith.constant 0 : index
    %c0_14 = arith.constant 0 : index
    %c0_15 = arith.constant 0 : index
    %28 = vector.load %arg5[%c0_13, %c0_14, %c0_15] : memref<2x32x96xf32, #tpu.memory_space<vmem>>, vector<1x32x96xf32>
    %29 = vector.shape_cast %28 : vector<1x32x96xf32> to vector<32x96xf32>
    %cst_16 = arith.constant dense<0.000000e+00> : vector<8x96xf32>
    %30 = tpu.matmul %25, %29, %cst_16 {dimension_numbers = #tpu.dot_dimension_numbers<[1], [0], [0], [1], [0, 0, 1, 1], [], []>} : vector<8x32xf32>, vector<32x96xf32>, vector<8x96xf32> -> vector<8x96xf32>
    %c0_17 = arith.constant 0 : index
    %c0_18 = arith.constant 0 : index
    %c0_19 = arith.constant 0 : index
    %31 = vector.load %arg6[%c0_17, %c0_18, %c0_19] : memref<2x1x96xf32, #tpu.memory_space<vmem>>, vector<1x1x96xf32>
    %32 = vector.shape_cast %31 : vector<1x1x96xf32> to vector<1x96xf32>
    %33 = vector.broadcast %32 : vector<1x96xf32> to vector<8x96xf32>
    %34 = arith.addf %30, %33 : vector<8x96xf32>
    %c0_20 = arith.constant 0 : index
    %c0_21 = arith.constant 0 : index
    %c0_22 = arith.constant 0 : index
    %35 = vector.load %arg7[%c0_20, %c0_21, %c0_22] : memref<2x32x32xf32, #tpu.memory_space<vmem>>, vector<1x32x32xf32>
    %36 = vector.shape_cast %35 : vector<1x32x32xf32> to vector<32x32xf32>
    %37 = vector.extract_strided_slice %34 {offsets = [0, 0], sizes = [8, 16], strides = [1, 1]} : vector<8x96xf32> to vector<8x16xf32>
    %38 = vector.extract_strided_slice %34 {offsets = [0, 32], sizes = [8, 16], strides = [1, 1]} : vector<8x96xf32> to vector<8x16xf32>
    %39 = vector.extract_strided_slice %34 {offsets = [0, 64], sizes = [8, 16], strides = [1, 1]} : vector<8x96xf32> to vector<8x16xf32>
    %40 = tpu.transpose %38, [1, 0] : vector<8x16xf32> -> vector<16x8xf32>
    %cst_23 = arith.constant dense<0.000000e+00> : vector<8x8xf32>
    %41 = tpu.matmul %37, %40, %cst_23 {dimension_numbers = #tpu.dot_dimension_numbers<[1], [0], [0], [1], [0, 0, 1, 1], [], []>} : vector<8x16xf32>, vector<16x8xf32>, vector<8x8xf32> -> vector<8x8xf32>
    %cst_24 = arith.constant 2.500000e-01 : f32
    %42 = vector.broadcast %cst_24 : f32 to vector<8x8xf32>
    %43 = arith.mulf %41, %42 : vector<8x8xf32>
    %44 = vector.broadcast %27 : vector<1x8xf32> to vector<8x8xf32>
    %45 = arith.addf %43, %44 : vector<8x8xf32>
    %cst_25 = arith.constant dense<0xFF800000> : vector<8xf32>
    %46 = vector.multi_reduction <maximumf>, %45, %cst_25 [1] : vector<8x8xf32> to vector<8xf32>
    %47 = vector.shape_cast %46 : vector<8xf32> to vector<8x1xf32>
    %48 = vector.broadcast %47 : vector<8x1xf32> to vector<8x8xf32>
    %49 = arith.subf %45, %48 : vector<8x8xf32>
    %50 = math.exp %49 : vector<8x8xf32>
    %cst_26 = arith.constant dense<0.000000e+00> : vector<8xf32>
    %51 = vector.multi_reduction <add>, %50, %cst_26 [1] : vector<8x8xf32> to vector<8xf32>
    %52 = vector.shape_cast %51 : vector<8xf32> to vector<8x1xf32>
    %53 = tpu.reciprocal %52 {approx = true} : vector<8x1xf32> -> vector<8x1xf32>
    %54 = vector.broadcast %53 : vector<8x1xf32> to vector<8x8xf32>
    %55 = arith.mulf %50, %54 : vector<8x8xf32>
    %cst_27 = arith.constant dense<0.000000e+00> : vector<8x16xf32>
    %56 = tpu.matmul %55, %39, %cst_27 {dimension_numbers = #tpu.dot_dimension_numbers<[1], [0], [0], [1], [0, 0, 1, 1], [], []>} : vector<8x8xf32>, vector<8x16xf32>, vector<8x16xf32> -> vector<8x16xf32>
    %57 = vector.extract_strided_slice %36 {offsets = [0, 0], sizes = [16, 32], strides = [1, 1]} : vector<32x32xf32> to vector<16x32xf32>
    %cst_28 = arith.constant dense<0.000000e+00> : vector<8x32xf32>
    %58 = tpu.matmul %56, %57, %cst_28 {dimension_numbers = #tpu.dot_dimension_numbers<[1], [0], [0], [1], [0, 0, 1, 1], [], []>} : vector<8x16xf32>, vector<16x32xf32>, vector<8x32xf32> -> vector<8x32xf32>
    %59 = vector.extract_strided_slice %34 {offsets = [0, 16], sizes = [8, 16], strides = [1, 1]} : vector<8x96xf32> to vector<8x16xf32>
    %60 = vector.extract_strided_slice %34 {offsets = [0, 48], sizes = [8, 16], strides = [1, 1]} : vector<8x96xf32> to vector<8x16xf32>
    %61 = vector.extract_strided_slice %34 {offsets = [0, 80], sizes = [8, 16], strides = [1, 1]} : vector<8x96xf32> to vector<8x16xf32>
    %62 = tpu.transpose %60, [1, 0] : vector<8x16xf32> -> vector<16x8xf32>
    %cst_29 = arith.constant dense<0.000000e+00> : vector<8x8xf32>
    %63 = tpu.matmul %59, %62, %cst_29 {dimension_numbers = #tpu.dot_dimension_numbers<[1], [0], [0], [1], [0, 0, 1, 1], [], []>} : vector<8x16xf32>, vector<16x8xf32>, vector<8x8xf32> -> vector<8x8xf32>
    %cst_30 = arith.constant 2.500000e-01 : f32
    %64 = vector.broadcast %cst_30 : f32 to vector<8x8xf32>
    %65 = arith.mulf %63, %64 : vector<8x8xf32>
    %66 = vector.broadcast %27 : vector<1x8xf32> to vector<8x8xf32>
    %67 = arith.addf %65, %66 : vector<8x8xf32>
    %cst_31 = arith.constant dense<0xFF800000> : vector<8xf32>
    %68 = vector.multi_reduction <maximumf>, %67, %cst_31 [1] : vector<8x8xf32> to vector<8xf32>
    %69 = vector.shape_cast %68 : vector<8xf32> to vector<8x1xf32>
    %70 = vector.broadcast %69 : vector<8x1xf32> to vector<8x8xf32>
    %71 = arith.subf %67, %70 : vector<8x8xf32>
    %72 = math.exp %71 : vector<8x8xf32>
    %cst_32 = arith.constant dense<0.000000e+00> : vector<8xf32>
    %73 = vector.multi_reduction <add>, %72, %cst_32 [1] : vector<8x8xf32> to vector<8xf32>
    %74 = vector.shape_cast %73 : vector<8xf32> to vector<8x1xf32>
    %75 = tpu.reciprocal %74 {approx = true} : vector<8x1xf32> -> vector<8x1xf32>
    %76 = vector.broadcast %75 : vector<8x1xf32> to vector<8x8xf32>
    %77 = arith.mulf %72, %76 : vector<8x8xf32>
    %cst_33 = arith.constant dense<0.000000e+00> : vector<8x16xf32>
    %78 = tpu.matmul %77, %61, %cst_33 {dimension_numbers = #tpu.dot_dimension_numbers<[1], [0], [0], [1], [0, 0, 1, 1], [], []>} : vector<8x8xf32>, vector<8x16xf32>, vector<8x16xf32> -> vector<8x16xf32>
    %79 = vector.extract_strided_slice %36 {offsets = [16, 0], sizes = [16, 32], strides = [1, 1]} : vector<32x32xf32> to vector<16x32xf32>
    %cst_34 = arith.constant dense<0.000000e+00> : vector<8x32xf32>
    %80 = tpu.matmul %78, %79, %cst_34 {dimension_numbers = #tpu.dot_dimension_numbers<[1], [0], [0], [1], [0, 0, 1, 1], [], []>} : vector<8x16xf32>, vector<16x32xf32>, vector<8x32xf32> -> vector<8x32xf32>
    %81 = arith.addf %58, %80 : vector<8x32xf32>
    %c0_35 = arith.constant 0 : index
    %c0_36 = arith.constant 0 : index
    %c0_37 = arith.constant 0 : index
    %82 = vector.load %arg8[%c0_35, %c0_36, %c0_37] : memref<2x1x32xf32, #tpu.memory_space<vmem>>, vector<1x1x32xf32>
    %83 = vector.shape_cast %82 : vector<1x1x32xf32> to vector<1x32xf32>
    %84 = vector.broadcast %83 : vector<1x32xf32> to vector<8x32xf32>
    %85 = arith.addf %81, %84 : vector<8x32xf32>
    %86 = arith.addf %85, %25 : vector<8x32xf32>
    %c0_38 = arith.constant 0 : index
    %c0_39 = arith.constant 0 : index
    %c0_40 = arith.constant 0 : index
    %87 = vector.load %arg9[%c0_38, %c0_39, %c0_40] : memref<2x1x32xf32, #tpu.memory_space<vmem>>, vector<1x1x32xf32>
    %88 = vector.shape_cast %87 : vector<1x1x32xf32> to vector<1x32xf32>
    %c0_41 = arith.constant 0 : index
    %c0_42 = arith.constant 0 : index
    %c0_43 = arith.constant 0 : index
    %89 = vector.load %arg10[%c0_41, %c0_42, %c0_43] : memref<2x1x32xf32, #tpu.memory_space<vmem>>, vector<1x1x32xf32>
    %90 = vector.shape_cast %89 : vector<1x1x32xf32> to vector<1x32xf32>
    %cst_44 = arith.constant dense<0.000000e+00> : vector<8xf32>
    %91 = vector.multi_reduction <add>, %86, %cst_44 [1] : vector<8x32xf32> to vector<8xf32>
    %92 = vector.shape_cast %91 : vector<8xf32> to vector<8x1xf32>
    %cst_45 = arith.constant 3.200000e+01 : f32
    %93 = vector.broadcast %cst_45 : f32 to vector<8x1xf32>
    %94 = arith.divf %92, %93 : vector<8x1xf32>
    %95 = vector.broadcast %94 : vector<8x1xf32> to vector<8x32xf32>
    %96 = arith.subf %86, %95 : vector<8x32xf32>
    %97 = arith.mulf %96, %96 : vector<8x32xf32>
    %cst_46 = arith.constant dense<0.000000e+00> : vector<8xf32>
    %98 = vector.multi_reduction <add>, %97, %cst_46 [1] : vector<8x32xf32> to vector<8xf32>
    %99 = vector.shape_cast %98 : vector<8xf32> to vector<8x1xf32>
    %cst_47 = arith.constant 3.200000e+01 : f32
    %100 = vector.broadcast %cst_47 : f32 to vector<8x1xf32>
    %101 = arith.divf %99, %100 : vector<8x1xf32>
    %102 = vector.broadcast %94 : vector<8x1xf32> to vector<8x32xf32>
    %103 = arith.subf %86, %102 : vector<8x32xf32>
    %cst_48 = arith.constant 9.99999996E-13 : f32
    %104 = vector.broadcast %cst_48 : f32 to vector<8x1xf32>
    %105 = arith.addf %101, %104 : vector<8x1xf32>
    %106 = math.rsqrt %105 : vector<8x1xf32>
    %107 = vector.broadcast %106 : vector<8x1xf32> to vector<8x32xf32>
    %108 = arith.mulf %103, %107 : vector<8x32xf32>
    %109 = vector.broadcast %88 : vector<1x32xf32> to vector<8x32xf32>
    %110 = arith.mulf %108, %109 : vector<8x32xf32>
    %111 = vector.broadcast %90 : vector<1x32xf32> to vector<8x32xf32>
    %112 = arith.addf %110, %111 : vector<8x32xf32>
    %c0_49 = arith.constant 0 : index
    %c0_50 = arith.constant 0 : index
    %c0_51 = arith.constant 0 : index
    %113 = vector.load %arg11[%c0_49, %c0_50, %c0_51] : memref<2x32x64xf32, #tpu.memory_space<vmem>>, vector<1x32x64xf32>
    %114 = vector.shape_cast %113 : vector<1x32x64xf32> to vector<32x64xf32>
    %cst_52 = arith.constant dense<0.000000e+00> : vector<8x64xf32>
    %115 = tpu.matmul %112, %114, %cst_52 {dimension_numbers = #tpu.dot_dimension_numbers<[1], [0], [0], [1], [0, 0, 1, 1], [], []>} : vector<8x32xf32>, vector<32x64xf32>, vector<8x64xf32> -> vector<8x64xf32>
    %c0_53 = arith.constant 0 : index
    %c0_54 = arith.constant 0 : index
    %c0_55 = arith.constant 0 : index
    %116 = vector.load %arg12[%c0_53, %c0_54, %c0_55] : memref<2x1x64xf32, #tpu.memory_space<vmem>>, vector<1x1x64xf32>
    %117 = vector.shape_cast %116 : vector<1x1x64xf32> to vector<1x64xf32>
    %118 = vector.broadcast %117 : vector<1x64xf32> to vector<8x64xf32>
    %119 = arith.addf %115, %118 : vector<8x64xf32>
    %cst_56 = arith.constant 5.000000e-01 : f32
    %120 = vector.broadcast %cst_56 : f32 to vector<8x64xf32>
    %121 = arith.mulf %120, %119 : vector<8x64xf32>
    %cst_57 = arith.constant 0.707106769 : f32
    %122 = vector.broadcast %cst_57 : f32 to vector<8x64xf32>
    %123 = arith.mulf %119, %122 : vector<8x64xf32>
    %124 = math.erf %123 : vector<8x64xf32>
    %cst_58 = arith.constant 1.000000e+00 : f32
    %125 = vector.broadcast %cst_58 : f32 to vector<8x64xf32>
    %126 = arith.addf %125, %124 : vector<8x64xf32>
    %127 = arith.mulf %121, %126 : vector<8x64xf32>
    %c0_59 = arith.constant 0 : index
    %c0_60 = arith.constant 0 : index
    %c0_61 = arith.constant 0 : index
    %128 = vector.load %arg13[%c0_59, %c0_60, %c0_61] : memref<2x64x32xf32, #tpu.memory_space<vmem>>, vector<1x64x32xf32>
    %129 = vector.shape_cast %128 : vector<1x64x32xf32> to vector<64x32xf32>
    %cst_62 = arith.constant dense<0.000000e+00> : vector<8x32xf32>
    %130 = tpu.matmul %127, %129, %cst_62 {dimension_numbers = #tpu.dot_dimension_numbers<[1], [0], [0], [1], [0, 0, 1, 1], [], []>} : vector<8x64xf32>, vector<64x32xf32>, vector<8x32xf32> -> vector<8x32xf32>
    %c0_63 = arith.constant 0 : index
    %c0_64 = arith.constant 0 : index
    %c0_65 = arith.constant 0 : index
    %131 = vector.load %arg14[%c0_63, %c0_64, %c0_65] : memref<2x1x32xf32, #tpu.memory_space<vmem>>, vector<1x1x32xf32>
    %132 = vector.shape_cast %131 : vector<1x1x32xf32> to vector<1x32xf32>
    %133 = vector.broadcast %132 : vector<1x32xf32> to vector<8x32xf32>
    %134 = arith.addf %130, %133 : vector<8x32xf32>
    %135 = arith.addf %134, %112 : vector<8x32xf32>
    %c0_66 = arith.constant 0 : index
    %c0_67 = arith.constant 0 : index
    %c0_68 = arith.constant 0 : index
    %136 = vector.load %arg15[%c0_66, %c0_67, %c0_68] : memref<2x1x32xf32, #tpu.memory_space<vmem>>, vector<1x1x32xf32>
    %137 = vector.shape_cast %136 : vector<1x1x32xf32> to vector<1x32xf32>
    %c0_69 = arith.constant 0 : index
    %c0_70 = arith.constant 0 : index
    %c0_71 = arith.constant 0 : index
    %138 = vector.load %arg16[%c0_69, %c0_70, %c0_71] : memref<2x1x32xf32, #tpu.memory_space<vmem>>, vector<1x1x32xf32>
    %139 = vector.shape_cast %138 : vector<1x1x32xf32> to vector<1x32xf32>
    %cst_72 = arith.constant dense<0.000000e+00> : vector<8xf32>
    %140 = vector.multi_reduction <add>, %135, %cst_72 [1] : vector<8x32xf32> to vector<8xf32>
    %141 = vector.shape_cast %140 : vector<8xf32> to vector<8x1xf32>
    %cst_73 = arith.constant 3.200000e+01 : f32
    %142 = vector.broadcast %cst_73 : f32 to vector<8x1xf32>
    %143 = arith.divf %141, %142 : vector<8x1xf32>
    %144 = vector.broadcast %143 : vector<8x1xf32> to vector<8x32xf32>
    %145 = arith.subf %135, %144 : vector<8x32xf32>
    %146 = arith.mulf %145, %145 : vector<8x32xf32>
    %cst_74 = arith.constant dense<0.000000e+00> : vector<8xf32>
    %147 = vector.multi_reduction <add>, %146, %cst_74 [1] : vector<8x32xf32> to vector<8xf32>
    %148 = vector.shape_cast %147 : vector<8xf32> to vector<8x1xf32>
    %cst_75 = arith.constant 3.200000e+01 : f32
    %149 = vector.broadcast %cst_75 : f32 to vector<8x1xf32>
    %150 = arith.divf %148, %149 : vector<8x1xf32>
    %151 = vector.broadcast %143 : vector<8x1xf32> to vector<8x32xf32>
    %152 = arith.subf %135, %151 : vector<8x32xf32>
    %cst_76 = arith.constant 9.99999996E-13 : f32
    %153 = vector.broadcast %cst_76 : f32 to vector<8x1xf32>
    %154 = arith.addf %150, %153 : vector<8x1xf32>
    %155 = math.rsqrt %154 : vector<8x1xf32>
    %156 = vector.broadcast %155 : vector<8x1xf32> to vector<8x32xf32>
    %157 = arith.mulf %152, %156 : vector<8x32xf32>
    %158 = vector.broadcast %137 : vector<1x32xf32> to vector<8x32xf32>
    %159 = arith.mulf %157, %158 : vector<8x32xf32>
    %160 = vector.broadcast %139 : vector<1x32xf32> to vector<8x32xf32>
    %161 = arith.addf %159, %160 : vector<8x32xf32>
    %c1 = arith.constant 1 : index
    %c0_77 = arith.constant 0 : index
    %c0_78 = arith.constant 0 : index
    %162 = vector.load %arg5[%c1, %c0_77, %c0_78] : memref<2x32x96xf32, #tpu.memory_space<vmem>>, vector<1x32x96xf32>
    %163 = vector.shape_cast %162 : vector<1x32x96xf32> to vector<32x96xf32>
    %cst_79 = arith.constant dense<0.000000e+00> : vector<8x96xf32>
    %164 = tpu.matmul %161, %163, %cst_79 {dimension_numbers = #tpu.dot_dimension_numbers<[1], [0], [0], [1], [0, 0, 1, 1], [], []>} : vector<8x32xf32>, vector<32x96xf32>, vector<8x96xf32> -> vector<8x96xf32>
    %c1_80 = arith.constant 1 : index
    %c0_81 = arith.constant 0 : index
    %c0_82 = arith.constant 0 : index
    %165 = vector.load %arg6[%c1_80, %c0_81, %c0_82] : memref<2x1x96xf32, #tpu.memory_space<vmem>>, vector<1x1x96xf32>
    %166 = vector.shape_cast %165 : vector<1x1x96xf32> to vector<1x96xf32>
    %167 = vector.broadcast %166 : vector<1x96xf32> to vector<8x96xf32>
    %168 = arith.addf %164, %167 : vector<8x96xf32>
    %c1_83 = arith.constant 1 : index
    %c0_84 = arith.constant 0 : index
    %c0_85 = arith.constant 0 : index
    %169 = vector.load %arg7[%c1_83, %c0_84, %c0_85] : memref<2x32x32xf32, #tpu.memory_space<vmem>>, vector<1x32x32xf32>
    %170 = vector.shape_cast %169 : vector<1x32x32xf32> to vector<32x32xf32>
    %171 = vector.extract_strided_slice %168 {offsets = [0, 0], sizes = [8, 16], strides = [1, 1]} : vector<8x96xf32> to vector<8x16xf32>
    %172 = vector.extract_strided_slice %168 {offsets = [0, 32], sizes = [8, 16], strides = [1, 1]} : vector<8x96xf32> to vector<8x16xf32>
    %173 = vector.extract_strided_slice %168 {offsets = [0, 64], sizes = [8, 16], strides = [1, 1]} : vector<8x96xf32> to vector<8x16xf32>
    %174 = tpu.transpose %172, [1, 0] : vector<8x16xf32> -> vector<16x8xf32>
    %cst_86 = arith.constant dense<0.000000e+00> : vector<8x8xf32>
    %175 = tpu.matmul %171, %174, %cst_86 {dimension_numbers = #tpu.dot_dimension_numbers<[1], [0], [0], [1], [0, 0, 1, 1], [], []>} : vector<8x16xf32>, vector<16x8xf32>, vector<8x8xf32> -> vector<8x8xf32>
    %cst_87 = arith.constant 2.500000e-01 : f32
    %176 = vector.broadcast %cst_87 : f32 to vector<8x8xf32>
    %177 = arith.mulf %175, %176 : vector<8x8xf32>
    %178 = vector.broadcast %27 : vector<1x8xf32> to vector<8x8xf32>
    %179 = arith.addf %177, %178 : vector<8x8xf32>
    %cst_88 = arith.constant dense<0xFF800000> : vector<8xf32>
    %180 = vector.multi_reduction <maximumf>, %179, %cst_88 [1] : vector<8x8xf32> to vector<8xf32>
    %181 = vector.shape_cast %180 : vector<8xf32> to vector<8x1xf32>
    %182 = vector.broadcast %181 : vector<8x1xf32> to vector<8x8xf32>
    %183 = arith.subf %179, %182 : vector<8x8xf32>
    %184 = math.exp %183 : vector<8x8xf32>
    %cst_89 = arith.constant dense<0.000000e+00> : vector<8xf32>
    %185 = vector.multi_reduction <add>, %184, %cst_89 [1] : vector<8x8xf32> to vector<8xf32>
    %186 = vector.shape_cast %185 : vector<8xf32> to vector<8x1xf32>
    %187 = tpu.reciprocal %186 {approx = true} : vector<8x1xf32> -> vector<8x1xf32>
    %188 = vector.broadcast %187 : vector<8x1xf32> to vector<8x8xf32>
    %189 = arith.mulf %184, %188 : vector<8x8xf32>
    %cst_90 = arith.constant dense<0.000000e+00> : vector<8x16xf32>
    %190 = tpu.matmul %189, %173, %cst_90 {dimension_numbers = #tpu.dot_dimension_numbers<[1], [0], [0], [1], [0, 0, 1, 1], [], []>} : vector<8x8xf32>, vector<8x16xf32>, vector<8x16xf32> -> vector<8x16xf32>
    %191 = vector.extract_strided_slice %170 {offsets = [0, 0], sizes = [16, 32], strides = [1, 1]} : vector<32x32xf32> to vector<16x32xf32>
    %cst_91 = arith.constant dense<0.000000e+00> : vector<8x32xf32>
    %192 = tpu.matmul %190, %191, %cst_91 {dimension_numbers = #tpu.dot_dimension_numbers<[1], [0], [0], [1], [0, 0, 1, 1], [], []>} : vector<8x16xf32>, vector<16x32xf32>, vector<8x32xf32> -> vector<8x32xf32>
    %193 = vector.extract_strided_slice %168 {offsets = [0, 16], sizes = [8, 16], strides = [1, 1]} : vector<8x96xf32> to vector<8x16xf32>
    %194 = vector.extract_strided_slice %168 {offsets = [0, 48], sizes = [8, 16], strides = [1, 1]} : vector<8x96xf32> to vector<8x16xf32>
    %195 = vector.extract_strided_slice %168 {offsets = [0, 80], sizes = [8, 16], strides = [1, 1]} : vector<8x96xf32> to vector<8x16xf32>
    %196 = tpu.transpose %194, [1, 0] : vector<8x16xf32> -> vector<16x8xf32>
    %cst_92 = arith.constant dense<0.000000e+00> : vector<8x8xf32>
    %197 = tpu.matmul %193, %196, %cst_92 {dimension_numbers = #tpu.dot_dimension_numbers<[1], [0], [0], [1], [0, 0, 1, 1], [], []>} : vector<8x16xf32>, vector<16x8xf32>, vector<8x8xf32> -> vector<8x8xf32>
    %cst_93 = arith.constant 2.500000e-01 : f32
    %198 = vector.broadcast %cst_93 : f32 to vector<8x8xf32>
    %199 = arith.mulf %197, %198 : vector<8x8xf32>
    %200 = vector.broadcast %27 : vector<1x8xf32> to vector<8x8xf32>
    %201 = arith.addf %199, %200 : vector<8x8xf32>
    %cst_94 = arith.constant dense<0xFF800000> : vector<8xf32>
    %202 = vector.multi_reduction <maximumf>, %201, %cst_94 [1] : vector<8x8xf32> to vector<8xf32>
    %203 = vector.shape_cast %202 : vector<8xf32> to vector<8x1xf32>
    %204 = vector.broadcast %203 : vector<8x1xf32> to vector<8x8xf32>
    %205 = arith.subf %201, %204 : vector<8x8xf32>
    %206 = math.exp %205 : vector<8x8xf32>
    %cst_95 = arith.constant dense<0.000000e+00> : vector<8xf32>
    %207 = vector.multi_reduction <add>, %206, %cst_95 [1] : vector<8x8xf32> to vector<8xf32>
    %208 = vector.shape_cast %207 : vector<8xf32> to vector<8x1xf32>
    %209 = tpu.reciprocal %208 {approx = true} : vector<8x1xf32> -> vector<8x1xf32>
    %210 = vector.broadcast %209 : vector<8x1xf32> to vector<8x8xf32>
    %211 = arith.mulf %206, %210 : vector<8x8xf32>
    %cst_96 = arith.constant dense<0.000000e+00> : vector<8x16xf32>
    %212 = tpu.matmul %211, %195, %cst_96 {dimension_numbers = #tpu.dot_dimension_numbers<[1], [0], [0], [1], [0, 0, 1, 1], [], []>} : vector<8x8xf32>, vector<8x16xf32>, vector<8x16xf32> -> vector<8x16xf32>
    %213 = vector.extract_strided_slice %170 {offsets = [16, 0], sizes = [16, 32], strides = [1, 1]} : vector<32x32xf32> to vector<16x32xf32>
    %cst_97 = arith.constant dense<0.000000e+00> : vector<8x32xf32>
    %214 = tpu.matmul %212, %213, %cst_97 {dimension_numbers = #tpu.dot_dimension_numbers<[1], [0], [0], [1], [0, 0, 1, 1], [], []>} : vector<8x16xf32>, vector<16x32xf32>, vector<8x32xf32> -> vector<8x32xf32>
    %215 = arith.addf %192, %214 : vector<8x32xf32>
    %c1_98 = arith.constant 1 : index
    %c0_99 = arith.constant 0 : index
    %c0_100 = arith.constant 0 : index
    %216 = vector.load %arg8[%c1_98, %c0_99, %c0_100] : memref<2x1x32xf32, #tpu.memory_space<vmem>>, vector<1x1x32xf32>
    %217 = vector.shape_cast %216 : vector<1x1x32xf32> to vector<1x32xf32>
    %218 = vector.broadcast %217 : vector<1x32xf32> to vector<8x32xf32>
    %219 = arith.addf %215, %218 : vector<8x32xf32>
    %220 = arith.addf %219, %161 : vector<8x32xf32>
    %c1_101 = arith.constant 1 : index
    %c0_102 = arith.constant 0 : index
    %c0_103 = arith.constant 0 : index
    %221 = vector.load %arg9[%c1_101, %c0_102, %c0_103] : memref<2x1x32xf32, #tpu.memory_space<vmem>>, vector<1x1x32xf32>
    %222 = vector.shape_cast %221 : vector<1x1x32xf32> to vector<1x32xf32>
    %c1_104 = arith.constant 1 : index
    %c0_105 = arith.constant 0 : index
    %c0_106 = arith.constant 0 : index
    %223 = vector.load %arg10[%c1_104, %c0_105, %c0_106] : memref<2x1x32xf32, #tpu.memory_space<vmem>>, vector<1x1x32xf32>
    %224 = vector.shape_cast %223 : vector<1x1x32xf32> to vector<1x32xf32>
    %cst_107 = arith.constant dense<0.000000e+00> : vector<8xf32>
    %225 = vector.multi_reduction <add>, %220, %cst_107 [1] : vector<8x32xf32> to vector<8xf32>
    %226 = vector.shape_cast %225 : vector<8xf32> to vector<8x1xf32>
    %cst_108 = arith.constant 3.200000e+01 : f32
    %227 = vector.broadcast %cst_108 : f32 to vector<8x1xf32>
    %228 = arith.divf %226, %227 : vector<8x1xf32>
    %229 = vector.broadcast %228 : vector<8x1xf32> to vector<8x32xf32>
    %230 = arith.subf %220, %229 : vector<8x32xf32>
    %231 = arith.mulf %230, %230 : vector<8x32xf32>
    %cst_109 = arith.constant dense<0.000000e+00> : vector<8xf32>
    %232 = vector.multi_reduction <add>, %231, %cst_109 [1] : vector<8x32xf32> to vector<8xf32>
    %233 = vector.shape_cast %232 : vector<8xf32> to vector<8x1xf32>
    %cst_110 = arith.constant 3.200000e+01 : f32
    %234 = vector.broadcast %cst_110 : f32 to vector<8x1xf32>
    %235 = arith.divf %233, %234 : vector<8x1xf32>
    %236 = vector.broadcast %228 : vector<8x1xf32> to vector<8x32xf32>
    %237 = arith.subf %220, %236 : vector<8x32xf32>
    %cst_111 = arith.constant 9.99999996E-13 : f32
    %238 = vector.broadcast %cst_111 : f32 to vector<8x1xf32>
    %239 = arith.addf %235, %238 : vector<8x1xf32>
    %240 = math.rsqrt %239 : vector<8x1xf32>
    %241 = vector.broadcast %240 : vector<8x1xf32> to vector<8x32xf32>
    %242 = arith.mulf %237, %241 : vector<8x32xf32>
    %243 = vector.broadcast %222 : vector<1x32xf32> to vector<8x32xf32>
    %244 = arith.mulf %242, %243 : vector<8x32xf32>
    %245 = vector.broadcast %224 : vector<1x32xf32> to vector<8x32xf32>
    %246 = arith.addf %244, %245 : vector<8x32xf32>
    %c1_112 = arith.constant 1 : index
    %c0_113 = arith.constant 0 : index
    %c0_114 = arith.constant 0 : index
    %247 = vector.load %arg11[%c1_112, %c0_113, %c0_114] : memref<2x32x64xf32, #tpu.memory_space<vmem>>, vector<1x32x64xf32>
    %248 = vector.shape_cast %247 : vector<1x32x64xf32> to vector<32x64xf32>
    %cst_115 = arith.constant dense<0.000000e+00> : vector<8x64xf32>
    %249 = tpu.matmul %246, %248, %cst_115 {dimension_numbers = #tpu.dot_dimension_numbers<[1], [0], [0], [1], [0, 0, 1, 1], [], []>} : vector<8x32xf32>, vector<32x64xf32>, vector<8x64xf32> -> vector<8x64xf32>
    %c1_116 = arith.constant 1 : index
    %c0_117 = arith.constant 0 : index
    %c0_118 = arith.constant 0 : index
    %250 = vector.load %arg12[%c1_116, %c0_117, %c0_118] : memref<2x1x64xf32, #tpu.memory_space<vmem>>, vector<1x1x64xf32>
    %251 = vector.shape_cast %250 : vector<1x1x64xf32> to vector<1x64xf32>
    %252 = vector.broadcast %251 : vector<1x64xf32> to vector<8x64xf32>
    %253 = arith.addf %249, %252 : vector<8x64xf32>
    %cst_119 = arith.constant 5.000000e-01 : f32
    %254 = vector.broadcast %cst_119 : f32 to vector<8x64xf32>
    %255 = arith.mulf %254, %253 : vector<8x64xf32>
    %cst_120 = arith.constant 0.707106769 : f32
    %256 = vector.broadcast %cst_120 : f32 to vector<8x64xf32>
    %257 = arith.mulf %253, %256 : vector<8x64xf32>
    %258 = math.erf %257 : vector<8x64xf32>
    %cst_121 = arith.constant 1.000000e+00 : f32
    %259 = vector.broadcast %cst_121 : f32 to vector<8x64xf32>
    %260 = arith.addf %259, %258 : vector<8x64xf32>
    %261 = arith.mulf %255, %260 : vector<8x64xf32>
    %c1_122 = arith.constant 1 : index
    %c0_123 = arith.constant 0 : index
    %c0_124 = arith.constant 0 : index
    %262 = vector.load %arg13[%c1_122, %c0_123, %c0_124] : memref<2x64x32xf32, #tpu.memory_space<vmem>>, vector<1x64x32xf32>
    %263 = vector.shape_cast %262 : vector<1x64x32xf32> to vector<64x32xf32>
    %cst_125 = arith.constant dense<0.000000e+00> : vector<8x32xf32>
    %264 = tpu.matmul %261, %263, %cst_125 {dimension_numbers = #tpu.dot_dimension_numbers<[1], [0], [0], [1], [0, 0, 1, 1], [], []>} : vector<8x64xf32>, vector<64x32xf32>, vector<8x32xf32> -> vector<8x32xf32>
    %c1_126 = arith.constant 1 : index
    %c0_127 = arith.constant 0 : index
    %c0_128 = arith.constant 0 : index
    %265 = vector.load %arg14[%c1_126, %c0_127, %c0_128] : memref<2x1x32xf32, #tpu.memory_space<vmem>>, vector<1x1x32xf32>
    %266 = vector.shape_cast %265 : vector<1x1x32xf32> to vector<1x32xf32>
    %267 = vector.broadcast %266 : vector<1x32xf32> to vector<8x32xf32>
    %268 = arith.addf %264, %267 : vector<8x32xf32>
    %269 = arith.addf %268, %246 : vector<8x32xf32>
    %c1_129 = arith.constant 1 : index
    %c0_130 = arith.constant 0 : index
    %c0_131 = arith.constant 0 : index
    %270 = vector.load %arg15[%c1_129, %c0_130, %c0_131] : memref<2x1x32xf32, #tpu.memory_space<vmem>>, vector<1x1x32xf32>
    %271 = vector.shape_cast %270 : vector<1x1x32xf32> to vector<1x32xf32>
    %c1_132 = arith.constant 1 : index
    %c0_133 = arith.constant 0 : index
    %c0_134 = arith.constant 0 : index
    %272 = vector.load %arg16[%c1_132, %c0_133, %c0_134] : memref<2x1x32xf32, #tpu.memory_space<vmem>>, vector<1x1x32xf32>
    %273 = vector.shape_cast %272 : vector<1x1x32xf32> to vector<1x32xf32>
    %cst_135 = arith.constant dense<0.000000e+00> : vector<8xf32>
    %274 = vector.multi_reduction <add>, %269, %cst_135 [1] : vector<8x32xf32> to vector<8xf32>
    %275 = vector.shape_cast %274 : vector<8xf32> to vector<8x1xf32>
    %cst_136 = arith.constant 3.200000e+01 : f32
    %276 = vector.broadcast %cst_136 : f32 to vector<8x1xf32>
    %277 = arith.divf %275, %276 : vector<8x1xf32>
    %278 = vector.broadcast %277 : vector<8x1xf32> to vector<8x32xf32>
    %279 = arith.subf %269, %278 : vector<8x32xf32>
    %280 = arith.mulf %279, %279 : vector<8x32xf32>
    %cst_137 = arith.constant dense<0.000000e+00> : vector<8xf32>
    %281 = vector.multi_reduction <add>, %280, %cst_137 [1] : vector<8x32xf32> to vector<8xf32>
    %282 = vector.shape_cast %281 : vector<8xf32> to vector<8x1xf32>
    %cst_138 = arith.constant 3.200000e+01 : f32
    %283 = vector.broadcast %cst_138 : f32 to vector<8x1xf32>
    %284 = arith.divf %282, %283 : vector<8x1xf32>
    %285 = vector.broadcast %277 : vector<8x1xf32> to vector<8x32xf32>
    %286 = arith.subf %269, %285 : vector<8x32xf32>
    %cst_139 = arith.constant 9.99999996E-13 : f32
    %287 = vector.broadcast %cst_139 : f32 to vector<8x1xf32>
    %288 = arith.addf %284, %287 : vector<8x1xf32>
    %289 = math.rsqrt %288 : vector<8x1xf32>
    %290 = vector.broadcast %289 : vector<8x1xf32> to vector<8x32xf32>
    %291 = arith.mulf %286, %290 : vector<8x32xf32>
    %292 = vector.broadcast %271 : vector<1x32xf32> to vector<8x32xf32>
    %293 = arith.mulf %291, %292 : vector<8x32xf32>
    %294 = vector.broadcast %273 : vector<1x32xf32> to vector<8x32xf32>
    %295 = arith.addf %293, %294 : vector<8x32xf32>
    %c0_140 = arith.constant 0 : index
    %c0_141 = arith.constant 0 : index
    %296 = vector.load %arg17[%c0_140, %c0_141] : memref<32x16xf32, #tpu.memory_space<vmem>>, vector<32x16xf32>
    %cst_142 = arith.constant dense<0.000000e+00> : vector<8x16xf32>
    %297 = tpu.matmul %295, %296, %cst_142 {dimension_numbers = #tpu.dot_dimension_numbers<[1], [0], [0], [1], [0, 0, 1, 1], [], []>} : vector<8x32xf32>, vector<32x16xf32>, vector<8x16xf32> -> vector<8x16xf32>
    %c0_143 = arith.constant 0 : index
    %c0_144 = arith.constant 0 : index
    %298 = vector.load %arg18[%c0_143, %c0_144] : memref<1x16xf32, #tpu.memory_space<vmem>>, vector<1x16xf32>
    %299 = vector.broadcast %298 : vector<1x16xf32> to vector<8x16xf32>
    %300 = arith.addf %297, %299 : vector<8x16xf32>
    %301 = math.tanh %300 : vector<8x16xf32>
    %c0_145 = arith.constant 0 : index
    %c0_146 = arith.constant 0 : index
    %302 = vector.load %arg19[%c0_145, %c0_146] : memref<1x16xf32, #tpu.memory_space<vmem>>, vector<1x16xf32>
    %303 = vector.broadcast %302 : vector<1x16xf32> to vector<8x16xf32>
    %304 = arith.mulf %301, %303 : vector<8x16xf32>
    %cst_147 = arith.constant dense<0.000000e+00> : vector<8xf32>
    %305 = vector.multi_reduction <add>, %304, %cst_147 [1] : vector<8x16xf32> to vector<8xf32>
    %306 = vector.shape_cast %305 : vector<8xf32> to vector<8x1xf32>
    %c0_148 = arith.constant 0 : index
    %c0_149 = arith.constant 0 : index
    %307 = vector.load %arg20[%c0_148, %c0_149] : memref<1x1xf32, #tpu.memory_space<vmem>>, vector<1x1xf32>
    %308 = vector.broadcast %307 : vector<1x1xf32> to vector<8x1xf32>
    %309 = arith.addf %306, %308 : vector<8x1xf32>
    %310 = math.exp %309 : vector<8x1xf32>
    %cst_150 = arith.constant dense<0.000000e+00> : vector<1xf32>
    %311 = vector.multi_reduction <add>, %310, %cst_150 [0] : vector<8x1xf32> to vector<1xf32>
    %312 = vector.shape_cast %311 : vector<1xf32> to vector<1x1xf32>
    %cst_151 = arith.constant 9.99999993E-9 : f32
    %313 = vector.broadcast %cst_151 : f32 to vector<1x1xf32>
    %314 = arith.addf %312, %313 : vector<1x1xf32>
    %315 = tpu.reciprocal %314 {approx = true} : vector<1x1xf32> -> vector<1x1xf32>
    %316 = vector.broadcast %315 : vector<1x1xf32> to vector<8x1xf32>
    %317 = arith.mulf %310, %316 : vector<8x1xf32>
    %318 = vector.broadcast %317 : vector<8x1xf32> to vector<8x32xf32>
    %319 = arith.mulf %295, %318 : vector<8x32xf32>
    %cst_152 = arith.constant dense<0.000000e+00> : vector<32xf32>
    %320 = vector.multi_reduction <add>, %319, %cst_152 [0] : vector<8x32xf32> to vector<32xf32>
    %321 = vector.shape_cast %320 : vector<32xf32> to vector<1x32xf32>
    %c0_153 = arith.constant 0 : index
    %c0_154 = arith.constant 0 : index
    %322 = vector.load %arg21[%c0_153, %c0_154] : memref<32x32xf32, #tpu.memory_space<vmem>>, vector<32x32xf32>
    %cst_155 = arith.constant dense<0.000000e+00> : vector<1x32xf32>
    %323 = tpu.matmul %321, %322, %cst_155 {dimension_numbers = #tpu.dot_dimension_numbers<[1], [0], [0], [1], [0, 0, 1, 1], [], []>} : vector<1x32xf32>, vector<32x32xf32>, vector<1x32xf32> -> vector<1x32xf32>
    %c0_156 = arith.constant 0 : index
    %c0_157 = arith.constant 0 : index
    %324 = vector.load %arg22[%c0_156, %c0_157] : memref<1x32xf32, #tpu.memory_space<vmem>>, vector<1x32xf32>
    %325 = arith.addf %323, %324 : vector<1x32xf32>
    %c0_158 = arith.constant 0 : index
    %c0_159 = arith.constant 0 : index
    %c0_160 = arith.constant 0 : index
    %326 = vector.load %arg23[%c0_158, %c0_159, %c0_160] : memref<1x1x32xf32, #tpu.memory_space<vmem>>, vector<1x1x32xf32>
    %327 = vector.shape_cast %326 : vector<1x1x32xf32> to vector<1x32xf32>
    %328 = vector.shape_cast %325 : vector<1x32xf32> to vector<1x1x32xf32>
    tpu.vector_store %arg23[%c0_158, %c0_159, %c0_160], %328 {strides = array<i32>} : memref<1x1x32xf32, #tpu.memory_space<vmem>>, vector<1x1x32xf32>,
    return
  }
  func.func @transform_0(%arg0: i32) -> (i32, i32, i32) {
    %c0_i32 = arith.constant 0 : i32
    %c0_i32_0 = arith.constant 0 : i32
    %c0_i32_1 = arith.constant 0 : i32
    return %arg0, %c0_i32, %c0_i32_0 : i32, i32, i32
  }
  func.func @transform_1(%arg0: i32) -> (i32, i32, i32) {
    %c0_i32 = arith.constant 0 : i32
    %c0_i32_0 = arith.constant 0 : i32
    %c0_i32_1 = arith.constant 0 : i32
    return %arg0, %c0_i32, %c0_i32_0 : i32, i32, i32
  }
  func.func @transform_2(%arg0: i32) -> (i32, i32) {
    %c0_i32 = arith.constant 0 : i32
    %c0_i32_0 = arith.constant 0 : i32
    %c0_i32_1 = arith.constant 0 : i32
    return %c0_i32, %c0_i32_0 : i32, i32
  }
  func.func @transform_3(%arg0: i32) -> (i32, i32) {
    %c0_i32 = arith.constant 0 : i32
    %c0_i32_0 = arith.constant 0 : i32
    %c0_i32_1 = arith.constant 0 : i32
    return %c0_i32, %c0_i32_0 : i32, i32
  }
  func.func @transform_4(%arg0: i32) -> (i32, i32, i32) {
    %c0_i32 = arith.constant 0 : i32
    %c0_i32_0 = arith.constant 0 : i32
    %c0_i32_1 = arith.constant 0 : i32
    %c0_i32_2 = arith.constant 0 : i32
    return %c0_i32, %c0_i32_0, %c0_i32_1 : i32, i32, i32
  }
  func.func @transform_5(%arg0: i32) -> (i32, i32, i32) {
    %c0_i32 = arith.constant 0 : i32
    %c0_i32_0 = arith.constant 0 : i32
    %c0_i32_1 = arith.constant 0 : i32
    %c0_i32_2 = arith.constant 0 : i32
    return %c0_i32, %c0_i32_0, %c0_i32_1 : i32, i32, i32
  }
  func.func @transform_6(%arg0: i32) -> (i32, i32, i32) {
    %c0_i32 = arith.constant 0 : i32
    %c0_i32_0 = arith.constant 0 : i32
    %c0_i32_1 = arith.constant 0 : i32
    %c0_i32_2 = arith.constant 0 : i32
    return %c0_i32, %c0_i32_0, %c0_i32_1 : i32, i32, i32
  }
  func.func @transform_7(%arg0: i32) -> (i32, i32, i32) {
    %c0_i32 = arith.constant 0 : i32
    %c0_i32_0 = arith.constant 0 : i32
    %c0_i32_1 = arith.constant 0 : i32
    %c0_i32_2 = arith.constant 0 : i32
    return %c0_i32, %c0_i32_0, %c0_i32_1 : i32, i32, i32
  }
  func.func @transform_8(%arg0: i32) -> (i32, i32, i32) {
    %c0_i32 = arith.constant 0 : i32
    %c0_i32_0 = arith.constant 0 : i32
    %c0_i32_1 = arith.constant 0 : i32
    %c0_i32_2 = arith.constant 0 : i32
    return %c0_i32, %c0_i32_0, %c0_i32_1 : i32, i32, i32
  }
  func.func @transform_9(%arg0: i32) -> (i32, i32, i32) {
    %c0_i32 = arith.constant 0 : i32
    %c0_i32_0 = arith.constant 0 : i32
    %c0_i32_1 = arith.constant 0 : i32
    %c0_i32_2 = arith.constant 0 : i32
    return %c0_i32, %c0_i32_0, %c0_i32_1 : i32, i32, i32
  }
  func.func @transform_10(%arg0: i32) -> (i32, i32, i32) {
    %c0_i32 = arith.constant 0 : i32
    %c0_i32_0 = arith.constant 0 : i32
    %c0_i32_1 = arith.constant 0 : i32
    %c0_i32_2 = arith.constant 0 : i32
    return %c0_i32, %c0_i32_0, %c0_i32_1 : i32, i32, i32
  }
  func.func @transform_11(%arg0: i32) -> (i32, i32, i32) {
    %c0_i32 = arith.constant 0 : i32
    %c0_i32_0 = arith.constant 0 : i32
    %c0_i32_1 = arith.constant 0 : i32
    %c0_i32_2 = arith.constant 0 : i32
    return %c0_i32, %c0_i32_0, %c0_i32_1 : i32, i32, i32
  }
  func.func @transform_12(%arg0: i32) -> (i32, i32, i32) {
    %c0_i32 = arith.constant 0 : i32
    %c0_i32_0 = arith.constant 0 : i32
    %c0_i32_1 = arith.constant 0 : i32
    %c0_i32_2 = arith.constant 0 : i32
    return %c0_i32, %c0_i32_0, %c0_i32_1 : i32, i32, i32
  }
  func.func @transform_13(%arg0: i32) -> (i32, i32, i32) {
    %c0_i32 = arith.constant 0 : i32
    %c0_i32_0 = arith.constant 0 : i32
    %c0_i32_1 = arith.constant 0 : i32
    %c0_i32_2 = arith.constant 0 : i32
    return %c0_i32, %c0_i32_0, %c0_i32_1 : i32, i32, i32
  }
  func.func @transform_14(%arg0: i32) -> (i32, i32, i32) {
    %c0_i32 = arith.constant 0 : i32
    %c0_i32_0 = arith.constant 0 : i32
    %c0_i32_1 = arith.constant 0 : i32
    %c0_i32_2 = arith.constant 0 : i32
    return %c0_i32, %c0_i32_0, %c0_i32_1 : i32, i32, i32
  }
  func.func @transform_15(%arg0: i32) -> (i32, i32, i32) {
    %c0_i32 = arith.constant 0 : i32
    %c0_i32_0 = arith.constant 0 : i32
    %c0_i32_1 = arith.constant 0 : i32
    %c0_i32_2 = arith.constant 0 : i32
    return %c0_i32, %c0_i32_0, %c0_i32_1 : i32, i32, i32
  }
  func.func @transform_16(%arg0: i32) -> (i32, i32) {
    %c0_i32 = arith.constant 0 : i32
    %c0_i32_0 = arith.constant 0 : i32
    %c0_i32_1 = arith.constant 0 : i32
    return %c0_i32, %c0_i32_0 : i32, i32
  }
  func.func @transform_17(%arg0: i32) -> (i32, i32) {
    %c0_i32 = arith.constant 0 : i32
    %c0_i32_0 = arith.constant 0 : i32
    %c0_i32_1 = arith.constant 0 : i32
    return %c0_i32, %c0_i32_0 : i32, i32
  }
  func.func @transform_18(%arg0: i32) -> (i32, i32) {
    %c0_i32 = arith.constant 0 : i32
    %c0_i32_0 = arith.constant 0 : i32
    %c0_i32_1 = arith.constant 0 : i32
    return %c0_i32, %c0_i32_0 : i32, i32
  }
  func.func @transform_19(%arg0: i32) -> (i32, i32) {
    %c0_i32 = arith.constant 0 : i32
    %c0_i32_0 = arith.constant 0 : i32
    %c0_i32_1 = arith.constant 0 : i32
    return %c0_i32, %c0_i32_0 : i32, i32
  }
  func.func @transform_20(%arg0: i32) -> (i32, i32) {
    %c0_i32 = arith.constant 0 : i32
    %c0_i32_0 = arith.constant 0 : i32
    %c0_i32_1 = arith.constant 0 : i32
    return %c0_i32, %c0_i32_0 : i32, i32
  }
  func.func @transform_21(%arg0: i32) -> (i32, i32) {
    %c0_i32 = arith.constant 0 : i32
    %c0_i32_0 = arith.constant 0 : i32
    %c0_i32_1 = arith.constant 0 : i32
    return %c0_i32, %c0_i32_0 : i32, i32
  }
  func.func @transform_22(%arg0: i32) -> (i32, i32, i32) {
    %c0_i32 = arith.constant 0 : i32
    %c0_i32_0 = arith.constant 0 : i32
    %c0_i32_1 = arith.constant 0 : i32
    return %arg0, %c0_i32, %c0_i32_0 : i32, i32, i32
  }
}

module attributes {stable_mosaic.version = 11 : i64} {
  func.func @_user_encoder_kernel(%arg0: i32, %arg1: memref<1x4x32xf32, #tpu.memory_space<vmem>>, %arg2: memref<1x4x1xf32, #tpu.memory_space<vmem>>, %arg3: memref<1x32xf32, #tpu.memory_space<vmem>>, %arg4: memref<32x96xf32, #tpu.memory_space<vmem>>, %arg5: memref<1x96xf32, #tpu.memory_space<vmem>>, %arg6: memref<32x16xf32, #tpu.memory_space<vmem>>, %arg7: memref<1x16xf32, #tpu.memory_space<vmem>>, %arg8: memref<1x16xf32, #tpu.memory_space<vmem>>, %arg9: memref<1x1xf32, #tpu.memory_space<vmem>>, %arg10: memref<1x1x32xf32, #tpu.memory_space<vmem>>) attributes {dimension_semantics = [#tpu.dimension_semantics<parallel>], iteration_bounds = array<i64: 2>, scalar_prefetch = 0 : i64, scratch_operands = 0 : i64, tpu.core_type = #tpu.core_type<tc>, window_params = [{transform_indices = @transform_0, window_bounds = array<i64: 1, 4, 32>}, {transform_indices = @transform_1, window_bounds = array<i64: 1, 4, 1>}, {pipeline_mode = #tpu.pipeline_mode<synchronous>, transform_indices = @transform_2, window_bounds = array<i64: 1, 32>}, {pipeline_mode = #tpu.pipeline_mode<synchronous>, transform_indices = @transform_3, window_bounds = array<i64: 32, 96>}, {pipeline_mode = #tpu.pipeline_mode<synchronous>, transform_indices = @transform_4, window_bounds = array<i64: 1, 96>}, {pipeline_mode = #tpu.pipeline_mode<synchronous>, transform_indices = @transform_5, window_bounds = array<i64: 32, 16>}, {pipeline_mode = #tpu.pipeline_mode<synchronous>, transform_indices = @transform_6, window_bounds = array<i64: 1, 16>}, {pipeline_mode = #tpu.pipeline_mode<synchronous>, transform_indices = @transform_7, window_bounds = array<i64: 1, 16>}, {pipeline_mode = #tpu.pipeline_mode<synchronous>, transform_indices = @transform_8, window_bounds = array<i64: 1, 1>}, {transform_indices = @transform_9, window_bounds = array<i64: 1, 1, 32>}]} {
    %c0 = arith.constant 0 : index
    %c0_0 = arith.constant 0 : index
    %c0_1 = arith.constant 0 : index
    %0 = vector.load %arg1[%c0, %c0_0, %c0_1] : memref<1x4x32xf32, #tpu.memory_space<vmem>>, vector<1x4x32xf32>
    %1 = vector.shape_cast %0 : vector<1x4x32xf32> to vector<4x32xf32>
    %c0_2 = arith.constant 0 : index
    %c0_3 = arith.constant 0 : index
    %c0_4 = arith.constant 0 : index
    %2 = vector.load %arg2[%c0_2, %c0_3, %c0_4] : memref<1x4x1xf32, #tpu.memory_space<vmem>>, vector<1x4x1xf32>
    %3 = vector.shape_cast %2 : vector<1x4x1xf32> to vector<4x1xf32>
    %4 = vector.broadcast %3 : vector<4x1xf32> to vector<4x32xf32>
    %5 = arith.mulf %1, %4 : vector<4x32xf32>
    %c0_5 = arith.constant 0 : index
    %c0_6 = arith.constant 0 : index
    %6 = vector.load %arg3[%c0_5, %c0_6] : memref<1x32xf32, #tpu.memory_space<vmem>>, vector<1x32xf32>
    %cst = arith.constant 1.000000e+00 : f32
    %7 = vector.broadcast %cst : f32 to vector<4x1xf32>
    %8 = arith.subf %7, %3 : vector<4x1xf32>
    %9 = vector.broadcast %6 : vector<1x32xf32> to vector<4x32xf32>
    %10 = vector.broadcast %8 : vector<4x1xf32> to vector<4x32xf32>
    %11 = arith.mulf %9, %10 : vector<4x32xf32>
    %12 = arith.addf %5, %11 : vector<4x32xf32>
    %c0_7 = arith.constant 0 : index
    %c0_8 = arith.constant 0 : index
    %13 = vector.load %arg4[%c0_7, %c0_8] : memref<32x96xf32, #tpu.memory_space<vmem>>, vector<32x96xf32>
    %cst_9 = arith.constant dense<0.000000e+00> : vector<4x96xf32>
    %14 = tpu.matmul %12, %13, %cst_9 {dimension_numbers = #tpu.dot_dimension_numbers<[1], [0], [0], [1], [0, 0, 1, 1], [], []>} : vector<4x32xf32>, vector<32x96xf32>, vector<4x96xf32> -> vector<4x96xf32>
    %c0_10 = arith.constant 0 : index
    %c0_11 = arith.constant 0 : index
    %15 = vector.load %arg5[%c0_10, %c0_11] : memref<1x96xf32, #tpu.memory_space<vmem>>, vector<1x96xf32>
    %16 = vector.broadcast %15 : vector<1x96xf32> to vector<4x96xf32>
    %17 = arith.addf %14, %16 : vector<4x96xf32>
    %18 = vector.extract_strided_slice %17 {offsets = [0, 0], sizes = [4, 16], strides = [1, 1]} : vector<4x96xf32> to vector<4x16xf32>
    %19 = vector.extract_strided_slice %17 {offsets = [0, 32], sizes = [4, 16], strides = [1, 1]} : vector<4x96xf32> to vector<4x16xf32>
    %20 = vector.extract_strided_slice %17 {offsets = [0, 64], sizes = [4, 16], strides = [1, 1]} : vector<4x96xf32> to vector<4x16xf32>
    %21 = tpu.transpose %19, [1, 0] : vector<4x16xf32> -> vector<16x4xf32>
    %cst_12 = arith.constant dense<0.000000e+00> : vector<4x4xf32>
    %22 = tpu.matmul %18, %21, %cst_12 {dimension_numbers = #tpu.dot_dimension_numbers<[1], [0], [0], [1], [0, 0, 1, 1], [], []>} : vector<4x16xf32>, vector<16x4xf32>, vector<4x4xf32> -> vector<4x4xf32>
    %cst_13 = arith.constant 2.500000e-01 : f32
    %23 = vector.broadcast %cst_13 : f32 to vector<4x4xf32>
    %24 = arith.mulf %22, %23 : vector<4x4xf32>
    %25 = math.exp %24 : vector<4x4xf32>
    %cst_14 = arith.constant dense<0.000000e+00> : vector<4xf32>
    %26 = vector.multi_reduction <add>, %25, %cst_14 [1] : vector<4x4xf32> to vector<4xf32>
    %27 = vector.shape_cast %26 : vector<4xf32> to vector<4x1xf32>
    %cst_15 = arith.constant 9.99999993E-9 : f32
    %28 = vector.broadcast %cst_15 : f32 to vector<4x1xf32>
    %29 = arith.addf %27, %28 : vector<4x1xf32>
    %30 = tpu.reciprocal %29 {approx = true} : vector<4x1xf32> -> vector<4x1xf32>
    %31 = vector.broadcast %30 : vector<4x1xf32> to vector<4x4xf32>
    %32 = arith.mulf %25, %31 : vector<4x4xf32>
    %cst_16 = arith.constant dense<0.000000e+00> : vector<4x16xf32>
    %33 = tpu.matmul %32, %20, %cst_16 {dimension_numbers = #tpu.dot_dimension_numbers<[1], [0], [0], [1], [0, 0, 1, 1], [], []>} : vector<4x4xf32>, vector<4x16xf32>, vector<4x16xf32> -> vector<4x16xf32>
    %34 = vector.extract_strided_slice %17 {offsets = [0, 16], sizes = [4, 16], strides = [1, 1]} : vector<4x96xf32> to vector<4x16xf32>
    %35 = vector.extract_strided_slice %17 {offsets = [0, 48], sizes = [4, 16], strides = [1, 1]} : vector<4x96xf32> to vector<4x16xf32>
    %36 = vector.extract_strided_slice %17 {offsets = [0, 80], sizes = [4, 16], strides = [1, 1]} : vector<4x96xf32> to vector<4x16xf32>
    %37 = tpu.transpose %35, [1, 0] : vector<4x16xf32> -> vector<16x4xf32>
    %cst_17 = arith.constant dense<0.000000e+00> : vector<4x4xf32>
    %38 = tpu.matmul %34, %37, %cst_17 {dimension_numbers = #tpu.dot_dimension_numbers<[1], [0], [0], [1], [0, 0, 1, 1], [], []>} : vector<4x16xf32>, vector<16x4xf32>, vector<4x4xf32> -> vector<4x4xf32>
    %cst_18 = arith.constant 2.500000e-01 : f32
    %39 = vector.broadcast %cst_18 : f32 to vector<4x4xf32>
    %40 = arith.mulf %38, %39 : vector<4x4xf32>
    %41 = math.exp %40 : vector<4x4xf32>
    %cst_19 = arith.constant dense<0.000000e+00> : vector<4xf32>
    %42 = vector.multi_reduction <add>, %41, %cst_19 [1] : vector<4x4xf32> to vector<4xf32>
    %43 = vector.shape_cast %42 : vector<4xf32> to vector<4x1xf32>
    %cst_20 = arith.constant 9.99999993E-9 : f32
    %44 = vector.broadcast %cst_20 : f32 to vector<4x1xf32>
    %45 = arith.addf %43, %44 : vector<4x1xf32>
    %46 = tpu.reciprocal %45 {approx = true} : vector<4x1xf32> -> vector<4x1xf32>
    %47 = vector.broadcast %46 : vector<4x1xf32> to vector<4x4xf32>
    %48 = arith.mulf %41, %47 : vector<4x4xf32>
    %cst_21 = arith.constant dense<0.000000e+00> : vector<4x16xf32>
    %49 = tpu.matmul %48, %36, %cst_21 {dimension_numbers = #tpu.dot_dimension_numbers<[1], [0], [0], [1], [0, 0, 1, 1], [], []>} : vector<4x4xf32>, vector<4x16xf32>, vector<4x16xf32> -> vector<4x16xf32>
    %50 = tpu.concatenate %33, %49 in 1 : vector<4x16xf32>, vector<4x16xf32> -> vector<4x32xf32>
    %c0_22 = arith.constant 0 : index
    %c0_23 = arith.constant 0 : index
    %51 = vector.load %arg6[%c0_22, %c0_23] : memref<32x16xf32, #tpu.memory_space<vmem>>, vector<32x16xf32>
    %cst_24 = arith.constant dense<0.000000e+00> : vector<4x16xf32>
    %52 = tpu.matmul %50, %51, %cst_24 {dimension_numbers = #tpu.dot_dimension_numbers<[1], [0], [0], [1], [0, 0, 1, 1], [], []>} : vector<4x32xf32>, vector<32x16xf32>, vector<4x16xf32> -> vector<4x16xf32>
    %c0_25 = arith.constant 0 : index
    %c0_26 = arith.constant 0 : index
    %53 = vector.load %arg7[%c0_25, %c0_26] : memref<1x16xf32, #tpu.memory_space<vmem>>, vector<1x16xf32>
    %54 = vector.broadcast %53 : vector<1x16xf32> to vector<4x16xf32>
    %55 = arith.addf %52, %54 : vector<4x16xf32>
    %56 = math.tanh %55 : vector<4x16xf32>
    %c0_27 = arith.constant 0 : index
    %c0_28 = arith.constant 0 : index
    %57 = vector.load %arg8[%c0_27, %c0_28] : memref<1x16xf32, #tpu.memory_space<vmem>>, vector<1x16xf32>
    %58 = vector.broadcast %57 : vector<1x16xf32> to vector<4x16xf32>
    %59 = arith.mulf %56, %58 : vector<4x16xf32>
    %cst_29 = arith.constant dense<0.000000e+00> : vector<4xf32>
    %60 = vector.multi_reduction <add>, %59, %cst_29 [1] : vector<4x16xf32> to vector<4xf32>
    %61 = vector.shape_cast %60 : vector<4xf32> to vector<4x1xf32>
    %c0_30 = arith.constant 0 : index
    %c0_31 = arith.constant 0 : index
    %62 = vector.load %arg9[%c0_30, %c0_31] : memref<1x1xf32, #tpu.memory_space<vmem>>, vector<1x1xf32>
    %63 = vector.broadcast %62 : vector<1x1xf32> to vector<4x1xf32>
    %64 = arith.addf %61, %63 : vector<4x1xf32>
    %65 = math.exp %64 : vector<4x1xf32>
    %cst_32 = arith.constant dense<0.000000e+00> : vector<1xf32>
    %66 = vector.multi_reduction <add>, %65, %cst_32 [0] : vector<4x1xf32> to vector<1xf32>
    %67 = vector.shape_cast %66 : vector<1xf32> to vector<1x1xf32>
    %cst_33 = arith.constant 9.99999993E-9 : f32
    %68 = vector.broadcast %cst_33 : f32 to vector<1x1xf32>
    %69 = arith.addf %67, %68 : vector<1x1xf32>
    %70 = tpu.reciprocal %69 {approx = true} : vector<1x1xf32> -> vector<1x1xf32>
    %71 = vector.broadcast %70 : vector<1x1xf32> to vector<4x1xf32>
    %72 = arith.mulf %65, %71 : vector<4x1xf32>
    %73 = vector.broadcast %72 : vector<4x1xf32> to vector<4x32xf32>
    %74 = arith.mulf %50, %73 : vector<4x32xf32>
    %cst_34 = arith.constant dense<0.000000e+00> : vector<32xf32>
    %75 = vector.multi_reduction <add>, %74, %cst_34 [0] : vector<4x32xf32> to vector<32xf32>
    %76 = vector.shape_cast %75 : vector<32xf32> to vector<1x32xf32>
    %c0_35 = arith.constant 0 : index
    %c0_36 = arith.constant 0 : index
    %c0_37 = arith.constant 0 : index
    %77 = vector.load %arg10[%c0_35, %c0_36, %c0_37] : memref<1x1x32xf32, #tpu.memory_space<vmem>>, vector<1x1x32xf32>
    %78 = vector.shape_cast %77 : vector<1x1x32xf32> to vector<1x32xf32>
    %79 = vector.shape_cast %76 : vector<1x32xf32> to vector<1x1x32xf32>
    tpu.vector_store %arg10[%c0_35, %c0_36, %c0_37], %79 {strides = array<i32>} : memref<1x1x32xf32, #tpu.memory_space<vmem>>, vector<1x1x32xf32>,
    return
  }
  func.func @transform_0(%arg0: i32) -> (i32, i32, i32) {
    %c0_i32 = arith.constant 0 : i32
    %c0_i32_0 = arith.constant 0 : i32
    %c0_i32_1 = arith.constant 0 : i32
    return %arg0, %c0_i32, %c0_i32_0 : i32, i32, i32
  }
  func.func @transform_1(%arg0: i32) -> (i32, i32, i32) {
    %c0_i32 = arith.constant 0 : i32
    %c0_i32_0 = arith.constant 0 : i32
    %c0_i32_1 = arith.constant 0 : i32
    return %arg0, %c0_i32, %c0_i32_0 : i32, i32, i32
  }
  func.func @transform_2(%arg0: i32) -> (i32, i32) {
    %c0_i32 = arith.constant 0 : i32
    %c0_i32_0 = arith.constant 0 : i32
    %c0_i32_1 = arith.constant 0 : i32
    return %c0_i32, %c0_i32_0 : i32, i32
  }
  func.func @transform_3(%arg0: i32) -> (i32, i32) {
    %c0_i32 = arith.constant 0 : i32
    %c0_i32_0 = arith.constant 0 : i32
    %c0_i32_1 = arith.constant 0 : i32
    return %c0_i32, %c0_i32_0 : i32, i32
  }
  func.func @transform_4(%arg0: i32) -> (i32, i32) {
    %c0_i32 = arith.constant 0 : i32
    %c0_i32_0 = arith.constant 0 : i32
    %c0_i32_1 = arith.constant 0 : i32
    return %c0_i32, %c0_i32_0 : i32, i32
  }
  func.func @transform_5(%arg0: i32) -> (i32, i32) {
    %c0_i32 = arith.constant 0 : i32
    %c0_i32_0 = arith.constant 0 : i32
    %c0_i32_1 = arith.constant 0 : i32
    return %c0_i32, %c0_i32_0 : i32, i32
  }
  func.func @transform_6(%arg0: i32) -> (i32, i32) {
    %c0_i32 = arith.constant 0 : i32
    %c0_i32_0 = arith.constant 0 : i32
    %c0_i32_1 = arith.constant 0 : i32
    return %c0_i32, %c0_i32_0 : i32, i32
  }
  func.func @transform_7(%arg0: i32) -> (i32, i32) {
    %c0_i32 = arith.constant 0 : i32
    %c0_i32_0 = arith.constant 0 : i32
    %c0_i32_1 = arith.constant 0 : i32
    return %c0_i32, %c0_i32_0 : i32, i32
  }
  func.func @transform_8(%arg0: i32) -> (i32, i32) {
    %c0_i32 = arith.constant 0 : i32
    %c0_i32_0 = arith.constant 0 : i32
    %c0_i32_1 = arith.constant 0 : i32
    return %c0_i32, %c0_i32_0 : i32, i32
  }
  func.func @transform_9(%arg0: i32) -> (i32, i32, i32) {
    %c0_i32 = arith.constant 0 : i32
    %c0_i32_0 = arith.constant 0 : i32
    %c0_i32_1 = arith.constant 0 : i32
    return %arg0, %c0_i32, %c0_i32_0 : i32, i32, i32
  }
}

</mosaic_0001>

<bundles_post_ra>
// kernel: model_bert_forward.3
= control target key start
LH: loop header
LB: loop body
LE: loop exit
PB: predicated region body
PF: predicated region fallthrough
CT: control target
= control target key end

     0   :  { %s1168_s11 = smov 0   ;;  %s1265_s0 = inlined_call_operand.vmem [shape: f32[2,4,32], index: 0, kind: input, shape index: {}]   ;;  %s1266_s1 = inlined_call_operand.vmem [shape: f32[2,4,1], index: 1, kind: input, shape index: {}]   ;;  %s1267_s2 = inlined_call_operand.vmem [shape: f32[1,32], index: 2, kind: input, shape index: {}]   ;;  %s1268_s3 = inlined_call_operand.vmem [shape: f32[32,96], index: 3, kind: input, shape index: {}]   ;;  %s1269_s4 = inlined_call_operand.vmem [shape: f32[1,96], index: 4, kind: input, shape index: {}]   ;;  %s1270_s5 = inlined_call_operand.vmem [shape: f32[32,16], index: 5, kind: input, shape index: {}]   ;;  %s1271_s6 = inlined_call_operand.vmem [shape: f32[1,16], index: 6, kind: input, shape index: {}]   ;;  %s1272_s7 = inlined_call_operand.vmem [shape: f32[1,16], index: 7, kind: input, shape index: {}]   ;;  %s1273_s8 = inlined_call_operand.<no memory space> [shape: f32[1,1], index: 8, kind: input, shape index: {}]   ;;  %s1274_s9 = inlined_call_operand.vmem [shape: f32[2,1,32], index: 9, kind: output, shape index: {}]  }
   0x1   :  { %v14_v0 = vstv %s1273_s8 }
   0x2   :  { %15 = vst [vmem:[#allocation2] sm:$0x1] %v14_v0 }
   0x3 LB: > { %s982_s12 = sadd.s32 4294967295, %s1104_s11   ;;  %p986_p0 = scmp.ge.s32.totalorder %s1104_s11, 1  ;;  %s1104_s11 = sphi %s1168_s11, %s21_s11  }
   0x4   : > { %p297_p1 = scmp.lt.s32.totalorder %s1104_s11, 3 }
   0x6   : > { %p298_p2 = pnand %p986_p0, %p297_p1 }
   0x7   : > { %p334_p3 = scmp.lt.s32.totalorder (!%p298_p2), %s982_s12, 1  ;;  %s1109_s10 = smov (!%p298_p2), 64  }
   0x8   : > { %301 = sbr.rel (%p298_p2) target bundleno = 2050 (0x802), region = 56  ;;  %s1110_s8 = smov (!%p298_p2), 96  }
   0x9   : > { %s1111_s13 = smov (!%p298_p2), 80   ;;  %s1112_s14 = smov (!%p298_p2), 112  }
   0xa   : > { %s1113_s15 = smov (!%p298_p2), 48   ;;  %s1114_s24 = smov (!%p298_p2), 16  }
   0xd   : > { %v1106_v1 = vmov 0   ;;  %s1276_s12 = smov (!%p334_p3, %s982_s12), 1  ;;  %v1107_v2 = vmov 0.0   ;;  %v371_v3 = vld [vmem:[%s1268_s3 + $0x18] sm:$0xff]  ;;  %v370_v4 = vld [vmem:[%s1268_s3 + $0x10] sm:$0xff]  ;;  %v369_v7 = vld [vmem:[%s1268_s3 + $0x8] sm:$0xff] }
   0xe   : > { %1083 = vset.pattern.permute.xlu0 %v1106_v1  ;;  %1024 = vmatprep.subr.mxu0 %v1107_v2  ;;  %s987_s16 = sshll.u32 %s1276_s12, 2  ;;  %v368_v8 = vld [vmem:[%s1268_s3] sm:$0xff]  ;;  %vm1108_vm0 = vmmov 0   ;;  %vm379_vm1 = vcmask 261120   ;;  %vm456_vm2 = vcmask 130048   ;;  %vm547_vm3 = vcmask 1043456  }
   0xf   : > { %1035 = vmatprep.subr.mxu1 %v1107_v2  ;;  %1025 = vmatpush3.msra.mxu0 %v371_v3  ;;  %s341_s19 = scalar_lea.vmem %s1266_s1, %s987_s16  ;;  %s337_s26 = scalar_lea.vmem %s1265_s0, %s987_s16  ;;  %v989_v11 = vld [vmem:[%s1267_s2] ss:$0 sm:$0xff]  ;;  %vm534_vm4 = vcmask 27648   ;;  %vm543_vm5 = vcmask 31744   ;;  %v792_v47 = vld [vmem:[%s1270_s5 + $0x18] sm:$0xff]  ;;  %v791_v48 = vld [vmem:[%s1270_s5 + $0x10] sm:$0xff] }
  0x10   : > { %1026 = vmatprep.subr.mxu0 %v1107_v2  ;;  %v346_v5 = vld [vmem:[%s341_s19] sm:$0xf]  ;;  %1032 = vmatprep.mubr.msk.f32.mxu0 %vm1108_vm0, %v1107_v2  ;;  %v790_v49 = vld [vmem:[%s1270_s5 + $0x8] sm:$0xff]  ;;  %vm882_vm6 = vcmask 125952   ;;  %vm896_vm7 = vcmask 3072   ;;  %vm913_vm8 = vcmask 257024  }
  0x11   : > { %1027 = vmatpush3.msra.mxu0 %v370_v4  ;;  %349 = vperm.xlu0 %1083, %v346_v5   ;;  %v354_v6 = vsub.f32 1.0, %v346_v5  ;;  %v345_v10 = vld [vmem:[%s337_s26] sm:$0xf]  ;;  %vm921_vm9 = vcmask 253952  }
  0x12   : > { %1028 = vmatprep.subr.mxu0 %v1107_v2  ;;  %1037 = vmatprep.mubr.msk.f32.mxu1 %vm1108_vm0, %v1107_v2  ;;  %v990_v16 = vld [vmem:[%s1269_s4] ss:$0 sm:$0xff] }
  0x13   : > { %1029 = vmatpush3.msra.mxu0 %v369_v7  ;;  %v789_v50 = vld [vmem:[%s1270_s5] sm:$0xff] }
  0x14   : > { %1030 = vmatprep.subr.mxu0 %v1107_v2  ;;  %v1000_v55 = vld [vmem:[%s1271_s6] ss:$0 sm:$0xff] }
  0x15   : > { %1031 = vmatpush3.msra.mxu0 %v368_v8  ;;  %363 = vperm.xlu0 %1083, %v354_v6   ;;  %v1002_v59 = vld [vmem:[%s1272_s7] ss:$0 sm:$0xff] }
  0x16   : > { %1055 = vmatprep.subr.mxu0 %v1107_v2  ;;  %v1003_v63 = vld [vmem:[#allocation2] ss:$0 sm:$0xff] }
  0x8c   : > { %v350_v9 = vpop.permute.xlu0 %349 }
  0x8d   : > { %v352_v13 = vmul.f32 %v350_v9, %v345_v10 }
  0x90   : > { %v364_v12 = vpop.permute.xlu0 %363 }
  0x91   : > { %v366_v14 = vmul.f32 %v989_v11, %v364_v12 }
  0x93   : > { %v367_v15 = vadd.f32 %v366_v14, %v352_v13 }
  0x95   : > { %1033 = vmatmul.mubr.msk.f32.vlgmr.msra.gmra.mxu0 %vm379_vm1, %v367_v15 }
  0x96   : > { %1063 = vmatprep.mubr.msk.f32.mxu0 %vm1108_vm0, %v1107_v2  ;;  %1056 = vmatpush3.msra.mxu0 %v792_v47 }
  0x97   : > { %1057 = vmatprep.subr.mxu0 %v1107_v2 }
  0x98   : > { %1058 = vmatpush3.msra.mxu0 %v791_v48 }
  0x99   : > { %1059 = vmatprep.subr.mxu0 %v1107_v2 }
  0x9a   : > { %1060 = vmatpush3.msra.mxu0 %v790_v49 }
  0x9b   : > { %1061 = vmatprep.subr.mxu0 %v1107_v2 }
  0x9c   : > { %1062 = vmatpush3.msra.mxu0 %v789_v50 }
 0x155   : > { %v449_v17 = vpop.f32.mrf.mxu0 }
 0x156   : > { %v450_v18 = vadd.f32 %v990_v16, %v449_v17 }
 0x157   : > { %v1034_v19 = vpop.f32.mrf.mxu0 }
 0x158   : > { %541 = vrot.lane.b32.xlu0 %v450_v18, %s1109_s10  ;;  %454 = vrot.lane.b32.xlu1 %v450_v18, %s1110_s8  ;;  %s344_s10 = scalar_lea.vmem %s1274_s9, %s1276_s12 }
 0x15c   : > { %622 = vrot.lane.b32.xlu0 %v450_v18, %s1111_s13 }
 0x160   : > { %620 = vrot.lane.b32.xlu0 %v450_v18, %s1112_s14 }
 0x1ca   : > { %v455_v20 = vpop.permute.xlu1 %454  ;;  %v542_v21 = vpop.permute.xlu0 %541 }
 0x1cb   : > { %1036 = vmatpush3.xpose.msk.msra.mxu1 %vm456_vm2, %v455_v20 }
 0x1cc   : > { %1040 = vmatprep.subr.mxu1 %v1107_v2 }
 0x1ce   : > { %1038 = vmatmul.mubr.msk.f32.vlgmr.msra.gmra.mxu1 %vm456_vm2, %v450_v18  ;;  %v623_v31 = vpop.permute.xlu0 %622 }
 0x1cf   : > { %1041 = vmatpush3.msk.msra.mxu1 %vm547_vm3, %v542_v21  ;;  %1042 = vmatprep.mubr.msk.f32.mxu1 %vm1108_vm0, %v1107_v2 }
 0x1d0   : > { %1045 = vmatprep.subr.mxu1 %v1107_v2 }
 0x1d2   : > { %v621_v33 = vpop.permute.xlu0 %620 }
 0x28e   : > { %v527_v22 = vpop.f32.mrf.mxu1 }
 0x28f   : > { %v531_v23 = vmul.f32 0.25, %v527_v22 }
 0x290   : > { %v1039_v24 = vpop.f32.mrf.mxu1 }
 0x291   : > { %v532_v25 = vmul.f32 1.442695, %v531_v23 }
 0x293   : > { %1084 = vpow2.f32 %v532_v25 }
 0x2a0   : > { %v1085_v26 = vpop.eup %1084 }
 0x2a1   : > { %v535_v27 = vsel %vm534_vm4, %v1085_v26, 0.0 }
 0x2a2   : > { %536 = vadd.xlane.f32.xlu1 %v535_v27 }
 0x2b3   : > { %707 = vrot.lane.b32.xlu1 %v450_v18, %s1113_s15 }
 0x32b   : > { %v537_v28 = vpop.xlane.xlu1 %536 }
 0x32c   : > { %v538_v29 = vadd.f32 1e-08, %v537_v28 }
 0x32e   : > { %1086 = vrcp.f32 %v538_v29 }
 0x32f   : > { %v708_v34 = vpop.permute.xlu1 %707 }
 0x33b   : > { %v1087_v30 = vpop.eup %1086 }
 0x33c   : > { %v540_v32 = vmul.f32 %v1087_v30, %v1085_v26 }
 0x33e   : > { %1043 = vmatmul.mubr.msk.f32.vlgmr.msra.gmra.mxu1 %vm543_vm5, %v540_v32 }
 0x33f   : > { %1046 = vmatpush3.xpose.msk.msra.mxu1 %vm456_vm2, %v623_v31  ;;  %1047 = vmatprep.mubr.msk.f32.mxu1 %vm1108_vm0, %v1107_v2 }
 0x340   : > { %1050 = vmatprep.subr.mxu1 %v1107_v2 }
 0x342   : > { %1048 = vmatmul.mubr.msk.f32.vlgmr.msra.gmra.mxu1 %vm456_vm2, %v621_v33 }
 0x343   : > { %1051 = vmatpush3.msk.msra.mxu1 %vm547_vm3, %v708_v34  ;;  %1052 = vmatprep.mubr.msk.f32.mxu1 %vm1108_vm0, %v1107_v2 }
 0x3fe   : > { %v616_v35 = vpop.f32.mrf.mxu1 }
 0x400   : > { %v1044_v36 = vpop.f32.mrf.mxu1 }
 0x402   : > { %v694_v37 = vpop.f32.mrf.mxu1 }
 0x403   : > { %v698_v38 = vmul.f32 0.25, %v694_v37 }
 0x404   : > { %v1049_v39 = vpop.f32.mrf.mxu1 }
 0x405   : > { %v699_v40 = vmul.f32 1.442695, %v698_v38 }
 0x407   : > { %1088 = vpow2.f32 %v699_v40 }
 0x414   : > { %v1089_v41 = vpop.eup %1088 }
 0x415   : > { %v701_v42 = vsel %vm534_vm4, %v1089_v41, 0.0 }
 0x416   : > { %702 = vadd.xlane.f32.xlu0 %v701_v42 }
 0x49f   : > { %v703_v43 = vpop.xlane.xlu0 %702 }
 0x4a0   : > { %v704_v44 = vadd.f32 1e-08, %v703_v43 }
 0x4a2   : > { %1090 = vrcp.f32 %v704_v44 }
 0x4af   : > { %v1091_v45 = vpop.eup %1090 }
 0x4b0   : > { %v706_v46 = vmul.f32 %v1091_v45, %v1089_v41 }
 0x4b2   : > { %1053 = vmatmul.mubr.msk.f32.vlgmr.msra.gmra.mxu1 %vm543_vm5, %v706_v46 }
 0x572   : > { %v780_v51 = vpop.f32.mrf.mxu1 }
 0x573   : > { %785 = vrot.lane.b32.xlu0 %v780_v51, %s1114_s24 }
 0x574   : > { %v1054_v52 = vpop.f32.mrf.mxu1 }
 0x5e5   : > { %v786_v53 = vpop.permute.xlu0 %785 }
 0x5e6   : > { %v788_v54 = vsel %vm456_vm2, %v616_v35, %v786_v53 }
 0x5e7   : > { %1064 = vmatmul.mubr.msk.f32.vlgmr.msra.gmra.mxu0 %vm379_vm1, %v788_v54 }
 0x6a7   : > { %v869_v56 = vpop.f32.mrf.mxu0 }
 0x6a8   : > { %v870_v57 = vadd.f32 %v1000_v55, %v869_v56 }
 0x6a9   : > { %v1065_v58 = vpop.f32.mrf.mxu0 }
 0x6aa   : > { %1092 = vtanh.f32 %v870_v57 }
 0x6b7   : > { %v1093_v60 = vpop.eup %1092 }
 0x6b8   : > { %v881_v61 = vmul.f32 %v1093_v60, %v1002_v59 }
 0x6ba   : > { %v883_v62 = vsel %vm882_vm6, %v881_v61, 0.0 }
 0x6bb   : > { %884 = vadd.xlane.f32.xlu1 %v883_v62 }
 0x744   : > { %v885_v0 = vpop.xlane.xlu1 %884 }
 0x745   : > { %v893_v1 = vadd.f32 %v1003_v63, %v885_v0 }
 0x747   : > { %v894_v2 = vmul.f32 1.442695, %v893_v1 }
 0x749   : > { %1094 = vpow2.f32 %v894_v2 }
 0x756   : > { %v1095_v3 = vpop.eup %1094 }
 0x757   : > { %v897_v4 = vsel %vm896_vm7, %v1095_v3, 0.0 }
 0x758   : > { %v898_v5 = vrot.slane %v897_v4, 4 }
 0x75a   : > { %v899_v6 = vadd.f32 %v898_v5, %v897_v4 }
 0x75c   : > { %v900_v7 = vrot.slane %v899_v6, 2 }
 0x75e   : > { %v901_v8 = vadd.f32 %v900_v7, %v899_v6 }
 0x760   : > { %v902_v9 = vrot.slane %v901_v8, 1 }
 0x762   : > { %v903_v10 = vadd.f32 %v902_v9, %v901_v8 }
 0x764   : > { %v904_v11 = vadd.f32 1e-08, %v903_v10 }
 0x766   : > { %1096 = vrcp.f32 %v904_v11 }
 0x773   : > { %v1097_v12 = vpop.eup %1096 }
 0x774   : > { %v906_v13 = vmul.f32 %v1097_v12, %v1095_v3 }
 0x776   : > { %909 = vperm.xlu0 %1083, %v906_v13  }
 0x7f1   : > { %v910_v14 = vpop.permute.xlu0 %909 }
 0x7f2   : > { %v912_v15 = vmul.f32 %v910_v14, %v788_v54 }
 0x7f4   : > { %v914_v16 = vsel %vm913_vm8, %v912_v15, 0.0 }
 0x7f5   : > { %v915_v17 = vrot.slane %v914_v16, 4 }
 0x7f7   : > { %v916_v18 = vadd.f32 %v915_v17, %v914_v16 }
 0x7f9   : > { %v917_v19 = vrot.slane %v916_v18, 2 }
 0x7fb   : > { %v918_v20 = vadd.f32 %v917_v19, %v916_v18 }
 0x7fd   : > { %v919_v21 = vrot.slane %v918_v20, 1 }
 0x7ff   : > { %v920_v22 = vadd.f32 %v919_v21, %v918_v20 }
 0x801   : > { %922 = vst.msk [vmem:[%s344_s10] sm:$0x1] %vm921_vm9, %v920_v22 }
 0x802 PF: > { %s21_s11 = sadd.s32 1, %s1104_s11  }
 0x803   : > { %p18_p4 = scmp.ge.s32.totalorder %s21_s11, 4  }
 0x805   :  { %20 = sbr.rel (!%p18_p4) target bundleno = 3 (0x3), region = 89 }

// kernel: model_bert_forward.2
= control target key start
LH: loop header
LB: loop body
LE: loop exit
PB: predicated region body
PF: predicated region fallthrough
CT: control target
= control target key end

     0   :  { %s3155_s29 = smov 0   ;;  %s3551_s0 = inlined_call_operand.vmem [shape: f32[14,8,32], index: 0, kind: input, shape index: {}]   ;;  %s3552_s1 = inlined_call_operand.vmem [shape: f32[14,1,8], index: 1, kind: input, shape index: {}]   ;;  %s3553_s2 = inlined_call_operand.vmem [shape: f32[1,32], index: 2, kind: input, shape index: {}]   ;;  %s3554_s3 = inlined_call_operand.vmem [shape: f32[1,32], index: 3, kind: input, shape index: {}]   ;;  %s3555_s4 = inlined_call_operand.vmem [shape: f32[2,32,96], index: 4, kind: input, shape index: {}]   ;;  %s3556_s5 = inlined_call_operand.vmem [shape: f32[2,1,96], index: 5, kind: input, shape index: {}]   ;;  %s3557_s6 = inlined_call_operand.vmem [shape: f32[2,32,32], index: 6, kind: input, shape index: {}]   ;;  %s3558_s7 = inlined_call_operand.vmem [shape: f32[2,1,32], index: 7, kind: input, shape index: {}]   ;;  %s3559_s8 = inlined_call_operand.vmem [shape: f32[2,1,32], index: 8, kind: input, shape index: {}, may-alias: {8,14}]   ;;  %s3560_s9 = inlined_call_operand.vmem [shape: f32[2,1,32], index: 9, kind: input, shape index: {}, may-alias: {9,15}]   ;;  %s3561_s10 = inlined_call_operand.vmem [shape: f32[2,32,64], index: 10, kind: input, shape index: {}]   ;;  %s3562_s11 = inlined_call_operand.vmem [shape: f32[2,1,64], index: 11, kind: input, shape index: {}]   ;;  %s3563_s12 = inlined_call_operand.vmem [shape: f32[2,64,32], index: 12, kind: input, shape index: {}]   ;;  %s3564_s13 = inlined_call_operand.vmem [shape: f32[2,1,32], index: 13, kind: input, shape index: {}]   ;;  %s3565_s14 = inlined_call_operand.vmem [shape: f32[2,1,32], index: 14, kind: input, shape index: {}, may-alias: {8,14}]   ;;  %s3566_s15 = inlined_call_operand.vmem [shape: f32[2,1,32], index: 15, kind: input, shape index: {}, may-alias: {9,15}]   ;;  %s3567_s16 = inlined_call_operand.vmem [shape: f32[32,16], index: 16, kind: input, shape index: {}]   ;;  %s3568_s17 = inlined_call_operand.vmem [shape: f32[1,16], index: 17, kind: input, shape index: {}]   ;;  %s3569_s18 = inlined_call_operand.vmem [shape: f32[1,16], index: 18, kind: input, shape index: {}]   ;;  %s3570_s19 = inlined_call_operand.<no memory space> [shape: f32[1,1], index: 19, kind: input, shape index: {}]   ;;  %s3571_s20 = inlined_call_operand.vmem [shape: f32[32,32], index: 20, kind: input, shape index: {}]   ;;  %s3572_s21 = inlined_call_operand.vmem [shape: f32[1,32], index: 21, kind: input, shape index: {}]   ;;  %s3573_s22 = inlined_call_operand.vmem [shape: f32[14,1,32], index: 22, kind: output, shape index: {}]  }
   0x1   :  { %3579 = sst [smem:[#allocation3_spill]] %s3551_s0  ;;  %v27_v0 = vstv %s3570_s19 }
   0x2   :  { %3580 = sst [smem:[#allocation4_spill]] %s3552_s1  ;;  %28 = vst [vmem:[#allocation2] sm:$0x1] %v27_v0 }
   0x3   :  { %3581 = sst [smem:[#allocation5_spill]] %s3553_s2 }
   0x4   :  { %3582 = sst [smem:[#allocation6_spill]] %s3554_s3 }
   0x5   :  { %3583 = sst [smem:[#allocation7_spill]] %s3555_s4 }
   0x6   :  { %3584 = sst [smem:[#allocation8_spill]] %s3556_s5 }
   0x7   :  { %3585 = sst [smem:[#allocation9_spill]] %s3557_s6 }
   0x8 LB: > { %s2637_s30 = sadd.s32 4294967295, %s3027_s29   ;;  %p2641_p0 = scmp.ge.s32.totalorder %s3027_s29, 1  ;;  %s3027_s29 = sphi %s3155_s29, %s34_s29  }
   0x9   : > { %p621_p1 = scmp.lt.s32.totalorder %s3027_s29, 15 }
   0xb   : > { %p622_p2 = pnand %p2641_p0, %p621_p1 }
   0xc   : > { %p683_p3 = scmp.lt.s32.totalorder (!%p622_p2), %s2637_s30, 13  ;;  %s3586_s23 = sld [smem:[#allocation3_spill]] (!%p622_p2) }
   0xd   : > { %625 = sbr.rel (%p622_p2) target bundleno = 6065 (0x17b1), region = 108  ;;  %s3587_s6 = sld [smem:[#allocation7_spill]] (!%p622_p2) }
   0xe   : > { %s3588_s0 = sld [smem:[#allocation5_spill]] (!%p622_p2)  ;;  %s3577_s2 = smov (!%p622_p2), 64  }
   0xf   : > { %s3589_s5 = sld [smem:[#allocation6_spill]] (!%p622_p2)  ;;  %s3032_s27 = smov (!%p622_p2), 96  }
  0x10   : > { %s3590_s26 = sld [smem:[#allocation8_spill]] (!%p622_p2) }
  0x11   : > { %s3592_s25 = sld [smem:[#allocation9_spill]] (!%p622_p2) }
  0x12   : > { %s3596_s30 = smov (!%p683_p3, %s2637_s30), 13  ;;  %vm696_vm0 = vcmask 261120   ;;  %v3029_v9 = vmov 0.0   ;;  %vm3030_vm1 = vmmov 0   ;;  %vm817_vm2 = vcmask 130048  }
  0x13   : > { %s2642_s19 = sshll.u32 %s3596_s30, 3  ;;  %v729_v8 = vld [vmem:[%s3587_s6 + $0x18] sm:$0xff]  ;;  %2795 = vmatprep.subr.mxu0 %v3029_v9  ;;  %v728_v10 = vld [vmem:[%s3587_s6 + $0x10] sm:$0xff]  ;;  %2803 = vmatprep.mubr.msk.f32.mxu0 %vm3030_vm1, %v3029_v9  ;;  %v727_v11 = vld [vmem:[%s3587_s6 + $0x8] sm:$0xff]  ;;  %vm900_vm3 = vcmask 64512   ;;  %vm1443_vm4 = vcmask 523264  }
  0x14   : > { %s686_s1 = scalar_lea.vmem %s3586_s23, %s2642_s19  ;;  %2796 = vmatpush3.msra.mxu0 %v729_v8  ;;  %2806 = vmatprep.subr.mxu1 %v3029_v9  ;;  %v726_v12 = vld [vmem:[%s3587_s6] sm:$0xff]  ;;  %s3591_s19 = sld [smem:[#allocation4_spill]]  ;;  %vm2477_vm5 = vcmask 7168   ;;  %vm2579_vm6 = vcmask 253952  }
  0x15   : > { %v693_v1 = vld [vmem:[%s686_s1] sm:$0xff]  ;;  %2797 = vmatprep.subr.mxu0 %v3029_v9  ;;  %2808 = vmatprep.mubr.msk.f32.mxu1 %vm3030_vm1, %v3029_v9  ;;  %s3034_s23 = smov 112   ;;  %s3578_s1 = smov 48  }
  0x16   : > { %v697_v2 = vsel %vm696_vm0, %v693_v1, 0.0  ;;  %2798 = vmatpush3.msra.mxu0 %v728_v10  ;;  %v2643_v17 = vld [vmem:[%s3588_s0] ss:$0 sm:$0xff]  ;;  %s3033_s0 = smov 80  }
  0x17   : > { %698 = vadd.xlane.f32.xlu0 %v697_v2  ;;  %2799 = vmatprep.subr.mxu0 %v3029_v9  ;;  %v2644_v19 = vld [vmem:[%s3589_s5] ss:$0 sm:$0xff]  ;;  %v813_v57 = vld [vmem:[%s3592_s25 + $0x18] sm:$0xff]  ;;  %v811_v61 = vld [vmem:[%s3592_s25 + $0x8] sm:$0xff] }
  0x18   : > { %2800 = vmatpush3.msra.mxu0 %v727_v11  ;;  %v2645_v22 = vld [vmem:[%s3590_s26] ss:$0 sm:$0xff]  ;;  %v812_v63 = vld [vmem:[%s3592_s25 + $0x10] sm:$0xff] }
  0x19   : > { %2801 = vmatprep.subr.mxu0 %v3029_v9  ;;  %v810_v62 = vld [vmem:[%s3592_s25] sm:$0xff] }
  0x1a   : > { %2802 = vmatpush3.msra.mxu0 %v726_v12  ;;  %s689_s4 = scalar_lea.vmem %s3591_s19, %s3596_s30 }
  0x1b   : > { %2826 = vmatprep.subr.mxu0 %v3029_v9  ;;  %v3220_v29 = vld [vmem:[%s689_s4] ss:$0 sm:$0xff]  ;;  %s692_s4 = scalar_lea.vmem %s3573_s22, %s3596_s30 }
  0xa0   : > { %v699_v3 = vpop.xlane.xlu0 %698 }
  0xa1   : > { %v701_v4 = vmul.f32 0.03125, %v699_v3 }
  0xa3   : > { %v702_v5 = vsub.f32 %v693_v1, %v701_v4 }
  0xa5   : > { %v703_v6 = vmul.f32 %v702_v5, %v702_v5 }
  0xa7   : > { %v704_v7 = vsel %vm696_vm0, %v703_v6, 0.0 }
  0xa8   : > { %705 = vadd.xlane.f32.xlu0 %v704_v7 }
 0x131   : > { %v706_v13 = vpop.xlane.xlu0 %705 }
 0x132   : > { %v707_v14 = vmul.f32 0.03125, %v706_v13 }
 0x134   : > { %v708_v15 = vadd.f32 1e-12, %v707_v14 }
 0x136   : > { %2985 = vrsqrt.f32 %v708_v15 }
 0x143   : > { %v2986_v16 = vpop.eup %2985 }
 0x144   : > { %v710_v18 = vmul.f32 %v2986_v16, %v702_v5  ;;  %v2656_v5 = vld [vmem:[%s3558_s7] ss:$0 sm:$0xff] }
 0x146   : > { %v717_v20 = vmul.f32 %v2643_v17, %v710_v18  ;;  %v1342_v17 = vld [vmem:[%s3561_s10 + $0x18] sm:$0xff]  ;;  %v1341_v18 = vld [vmem:[%s3561_s10 + $0x10] sm:$0xff] }
 0x148   : > { %v3199_v21 = vadd.f32 %v2644_v19, %v717_v20  ;;  %v1340_v19 = vld [vmem:[%s3561_s10 + $0x8] sm:$0xff]  ;;  %v1339_v20 = vld [vmem:[%s3561_s10] sm:$0xff] }
 0x14a   : > { %2804 = vmatmul.mubr.msk.f32.vlgmr.msra.gmra.mxu0 %vm696_vm0, %v3199_v21 }
 0x14b   : > { %2830 = vmatprep.mubr.msk.f32.mxu0 %vm3030_vm1, %v3029_v9  ;;  %2827 = vmatpush3.msra.mxu0 %v813_v57 }
 0x14c   : > { %2828 = vmatprep.subr.mxu0 %v3029_v9 }
 0x14d   : > { %2829 = vmatpush3.msra.mxu0 %v812_v63 }
 0x14e   : > { %2840 = vmatprep.subr.mxu0 %v3029_v9 }
 0x20a   : > { %v806_v23 = vpop.f32.mrf.mxu0 }
 0x20b   : > { %v807_v24 = vadd.f32 %v2645_v22, %v806_v23 }
 0x20c   : > { %v2805_v25 = vpop.f32.mrf.mxu0 }
 0x20d   : > { %912 = vrot.lane.b32.xlu0 %v807_v24, %s3577_s2  ;;  %815 = vrot.lane.b32.xlu1 %v807_v24, %s3032_s27  ;;  %v2657_v25 = vld [vmem:[%s3559_s8] ss:$0 sm:$0xff] }
 0x27f   : > { %v816_v26 = vpop.permute.xlu1 %815  ;;  %v913_v27 = vpop.permute.xlu0 %912 }
 0x280   : > { %2807 = vmatpush3.xpose.msk.msra.mxu1 %vm817_vm2, %v816_v26 }
 0x281   : > { %2811 = vmatprep.subr.mxu1 %v3029_v9 }
 0x283   : > { %2809 = vmatmul.mubr.msk.f32.vlgmr.msra.gmra.mxu1 %vm817_vm2, %v807_v24 }
 0x284   : > { %2812 = vmatpush3.msra.mxu1 %v913_v27  ;;  %2813 = vmatprep.mubr.msk.f32.mxu1 %vm3030_vm1, %v3029_v9  ;;  %v2658_v27 = vld [vmem:[%s3560_s9] ss:$0 sm:$0xff] }
 0x285   : > { %2816 = vmatprep.subr.mxu1 %v3029_v9 }
 0x343   : > { %v888_v28 = vpop.f32.mrf.mxu1 }
 0x344   : > { %v892_v30 = vmul.f32 0.25, %v888_v28 }
 0x345   : > { %v2810_v31 = vpop.f32.mrf.mxu1 }
 0x346   : > { %v899_v32 = vadd.f32 %v3220_v29, %v892_v30  ;;  %v1435_v31 = vld [vmem:[%s3563_s12 + $0x38] sm:$0xff] }
 0x348   : > { %v901_v33 = vsel %vm900_vm3, %v899_v32, -inf }
 0x349   : > { %902 = vmax.xlane.f32.xlu1 %v901_v33  ;;  %v1433_v33 = vld [vmem:[%s3563_s12 + $0x28] sm:$0xff] }
 0x3d2   : > { %v903_v34 = vpop.xlane.xlu1 %902 }
 0x3d3   : > { %v904_v35 = vsub.f32 %v899_v32, %v903_v34  ;;  %v1434_v32 = vld [vmem:[%s3563_s12 + $0x30] sm:$0xff]  ;;  %v1432_v34 = vld [vmem:[%s3563_s12 + $0x20] sm:$0xff] }
 0x3d5   : > { %v905_v36 = vmul.f32 1.442695, %v904_v35  ;;  %v1431_v35 = vld [vmem:[%s3563_s12 + $0x18] sm:$0xff] }
 0x3d7   : > { %2987 = vpow2.f32 %v905_v36  ;;  %v1430_v36 = vld [vmem:[%s3563_s12 + $0x10] sm:$0xff] }
 0x3e4   : > { %v2988_v37 = vpop.eup %2987 }
 0x3e5   : > { %v907_v38 = vsel %vm900_vm3, %v2988_v37, 0.0 }
 0x3e6   : > { %908 = vadd.xlane.f32.xlu0 %v907_v38  ;;  %v1428_v38 = vld [vmem:[%s3563_s12] sm:$0xff] }
 0x3fc   : > { %990 = vrot.lane.b32.xlu0 %v807_v24, %s3033_s0 }
 0x400   : > { %988 = vrot.lane.b32.xlu0 %v807_v24, %s3034_s23 }
 0x46f   : > { %v909_v39 = vpop.xlane.xlu0 %908 }
 0x470   : > { %2989 = vrcp.f32 %v909_v39  ;;  %v2659_v39 = vld [vmem:[%s3562_s11] ss:$0 sm:$0xff] }
 0x473   : > { %v991_v41 = vpop.permute.xlu0 %990 }
 0x477   : > { %v989_v43 = vpop.permute.xlu0 %988 }
 0x47d   : > { %v2990_v40 = vpop.eup %2989 }
 0x47e   : > { %v911_v42 = vmul.f32 %v2990_v40, %v2988_v37  ;;  %v1429_v37 = vld [vmem:[%s3563_s12 + $0x8] sm:$0xff] }
 0x480   : > { %2814 = vmatmul.mubr.msk.f32.vlgmr.msra.gmra.mxu1 %vm900_vm3, %v911_v42 }
 0x481   : > { %2817 = vmatpush3.xpose.msk.msra.mxu1 %vm817_vm2, %v991_v41  ;;  %2818 = vmatprep.mubr.msk.f32.mxu1 %vm3030_vm1, %v3029_v9 }
 0x482   : > { %2821 = vmatprep.subr.mxu1 %v3029_v9 }
 0x484   : > { %2819 = vmatmul.mubr.msk.f32.vlgmr.msra.gmra.mxu1 %vm817_vm2, %v989_v43 }
 0x485   : > { %2823 = vmatprep.mubr.msk.f32.mxu1 %vm3030_vm1, %v3029_v9 }
 0x540   : > { %v984_v44 = vpop.f32.mrf.mxu1 }
 0x542   : > { %v2815_v45 = vpop.f32.mrf.mxu1 }
 0x544   : > { %v1062_v46 = vpop.f32.mrf.mxu1 }
 0x545   : > { %v1066_v47 = vmul.f32 0.25, %v1062_v46 }
 0x546   : > { %v2820_v48 = vpop.f32.mrf.mxu1 }
 0x547   : > { %v1067_v49 = vadd.f32 %v3220_v29, %v1066_v47  ;;  %v2661_v48 = vld [vmem:[%s3564_s13] ss:$0 sm:$0xff] }
 0x549   : > { %v1068_v50 = vsel %vm900_vm3, %v1067_v49, -inf }
 0x54a   : > { %1069 = vmax.xlane.f32.xlu1 %v1068_v50 }
 0x55b   : > { %1079 = vrot.lane.b32.xlu1 %v807_v24, %s3578_s1 }
 0x5d3   : > { %v1070_v51 = vpop.xlane.xlu1 %1069 }
 0x5d4   : > { %v1071_v52 = vsub.f32 %v1067_v49, %v1070_v51 }
 0x5d6   : > { %v1072_v53 = vmul.f32 1.442695, %v1071_v52 }
 0x5d7   : > { %v1080_v54 = vpop.permute.xlu1 %1079 }
 0x5d8   : > { %2991 = vpow2.f32 %v1072_v53  ;;  %2822 = vmatpush3.msra.mxu1 %v1080_v54 }
 0x5d9   : > { %2833 = vmatprep.subr.mxu1 %v3029_v9 }
 0x5e5   : > { %v2992_v55 = vpop.eup %2991 }
 0x5e6   : > { %v1074_v56 = vsel %vm900_vm3, %v2992_v55, 0.0 }
 0x5e7   : > { %1075 = vadd.xlane.f32.xlu0 %v1074_v56 }
 0x670   : > { %v1076_v58 = vpop.xlane.xlu0 %1075 }
 0x671   : > { %2993 = vrcp.f32 %v1076_v58 }
 0x67e   : > { %v2994_v59 = vpop.eup %2993 }
 0x67f   : > { %v1078_v60 = vmul.f32 %v2994_v59, %v2992_v55  ;;  %v2668_v59 = vld [vmem:[%s3587_s6 + $0x38] sm:$0xff] }
 0x681   : > { %2824 = vmatmul.mubr.msk.f32.vlgmr.msra.gmra.mxu1 %vm900_vm3, %v1078_v60  ;;  %v2667_v60 = vld [vmem:[%s3587_s6 + $0x30] sm:$0xff] }
 0x682   : > { %2834 = vmatpush3.msra.mxu1 %v811_v61  ;;  %2837 = vmatprep.mubr.msk.f32.mxu1 %vm3030_vm1, %v3029_v9  ;;  %v2666_v61 = vld [vmem:[%s3587_s6 + $0x28] sm:$0xff] }
 0x683   : > { %2835 = vmatprep.subr.mxu1 %v3029_v9 }
 0x684   : > { %2836 = vmatpush3.msra.mxu1 %v810_v62  ;;  %v2665_v62 = vld [vmem:[%s3587_s6 + $0x20] sm:$0xff] }
 0x685   : > { %2838 = vmatmul.mubr.msk.f32.vlgmr.msra.gmra.mxu1 %vm817_vm2, %v984_v44  ;;  %2851 = vmatprep.subr.mxu1 %v3029_v9 }
 0x686   : > { %2867 = vmatprep.mubr.msk.f32.mxu1 %vm3030_vm1, %v3029_v9  ;;  %2852 = vmatpush3.msra.mxu1 %v1435_v31 }
 0x687   : > { %2853 = vmatprep.subr.mxu1 %v3029_v9 }
 0x688   : > { %2854 = vmatpush3.msra.mxu1 %v1434_v32 }
 0x689   : > { %2855 = vmatprep.subr.mxu1 %v3029_v9 }
 0x68a   : > { %2856 = vmatpush3.msra.mxu1 %v1433_v33 }
 0x68b   : > { %2857 = vmatprep.subr.mxu1 %v3029_v9 }
 0x68c   : > { %2858 = vmatpush3.msra.mxu1 %v1432_v34 }
 0x68d   : > { %2859 = vmatprep.subr.mxu1 %v3029_v9 }
 0x68e   : > { %2860 = vmatpush3.msra.mxu1 %v1431_v35 }
 0x68f   : > { %2861 = vmatprep.subr.mxu1 %v3029_v9 }
 0x690   : > { %2862 = vmatpush3.msra.mxu1 %v1430_v36 }
 0x691   : > { %2863 = vmatprep.subr.mxu1 %v3029_v9 }
 0x692   : > { %2864 = vmatpush3.msra.mxu1 %v1429_v37 }
 0x693   : > { %2865 = vmatprep.subr.mxu1 %v3029_v9 }
 0x694   : > { %2866 = vmatpush3.msra.mxu1 %v1428_v38 }
 0x695   : > { %2886 = vmatprep.subr.mxu1 %v3029_v9 }
 0x741   : > { %v1151_v0 = vpop.f32.mrf.mxu1 }
 0x742   : > { %2831 = vmatmul.mubr.msk.f32.vlgmr.msra.gmra.mxu0 %vm817_vm2, %v1151_v0 }
 0x743   : > { %v2825_v1 = vpop.f32.mrf.mxu1  ;;  %2848 = vmatprep.mubr.msk.f32.mxu0 %vm3030_vm1, %v3029_v9  ;;  %2841 = vmatpush3.msra.mxu0 %v1342_v17 }
 0x744   : > { %2842 = vmatprep.subr.mxu0 %v3029_v9 }
 0x745   : > { %v1297_v2 = vpop.f32.mrf.mxu1  ;;  %2843 = vmatpush3.msra.mxu0 %v1341_v18 }
 0x746   : > { %2844 = vmatprep.subr.mxu0 %v3029_v9 }
 0x747   : > { %v2839_v3 = vpop.f32.mrf.mxu1  ;;  %2845 = vmatpush3.msra.mxu0 %v1340_v19 }
 0x748   : > { %2846 = vmatprep.subr.mxu0 %v3029_v9  ;;  %v2663_v3 = vld [vmem:[%s3565_s14] ss:$0 sm:$0xff] }
 0x749   : > { %2847 = vmatpush3.msra.mxu0 %v1339_v20 }
 0x74a   : > { %2870 = vmatprep.subr.mxu0 %v3029_v9 }
 0x802   : > { %v1224_v4 = vpop.f32.mrf.mxu0 }
 0x803   : > { %v1298_v6 = vadd.f32 %v1297_v2, %v1224_v4 }
 0x804   : > { %v2832_v7 = vpop.f32.mrf.mxu0 }
 0x805   : > { %v1308_v8 = vadd.f32 %v2656_v5, %v1298_v6  ;;  %v2664_v5 = vld [vmem:[%s3566_s15] ss:$0 sm:$0xff] }
 0x807   : > { %v1309_v10 = vadd.f32 %v1308_v8, %v3199_v21  ;;  %v2670_v8 = vld [vmem:[%s3590_s26 + $0x1] ss:$0 sm:$0xff] }
 0x809   : > { %v1312_v11 = vsel %vm696_vm0, %v1309_v10, 0.0 }
 0x80a   : > { %1313 = vadd.xlane.f32.xlu1 %v1312_v11 }
 0x893   : > { %v1314_v12 = vpop.xlane.xlu1 %1313 }
 0x894   : > { %v1315_v13 = vmul.f32 0.03125, %v1314_v12 }
 0x896   : > { %v1316_v14 = vsub.f32 %v1309_v10, %v1315_v13 }
 0x898   : > { %v1317_v15 = vmul.f32 %v1316_v14, %v1316_v14 }
 0x89a   : > { %v1318_v16 = vsel %vm696_vm0, %v1317_v15, 0.0 }
 0x89b   : > { %1319 = vadd.xlane.f32.xlu0 %v1318_v16 }
 0x924   : > { %v1320_v21 = vpop.xlane.xlu0 %1319 }
 0x925   : > { %v1321_v22 = vmul.f32 0.03125, %v1320_v21 }
 0x927   : > { %v1322_v23 = vadd.f32 1e-12, %v1321_v22 }
 0x929   : > { %2995 = vrsqrt.f32 %v1322_v23 }
 0x936   : > { %v2996_v24 = vpop.eup %2995 }
 0x937   : > { %v1324_v26 = vmul.f32 %v2996_v24, %v1316_v14 }
 0x939   : > { %v1331_v28 = vmul.f32 %v2657_v25, %v1324_v26 }
 0x93b   : > { %v1338_v30 = vadd.f32 %v2658_v27, %v1331_v28 }
 0x93d   : > { %2849 = vmatmul.mubr.msk.f32.vlgmr.msra.gmra.mxu0 %vm696_vm0, %v1338_v30 }
 0x93e   : > { %2878 = vmatprep.mubr.msk.f32.mxu0 %vm3030_vm1, %v3029_v9  ;;  %2871 = vmatpush3.msra.mxu0 %v2668_v59 }
 0x93f   : > { %2872 = vmatprep.subr.mxu0 %v3029_v9 }
 0x940   : > { %2873 = vmatpush3.msra.mxu0 %v2667_v60 }
 0x941   : > { %2874 = vmatprep.subr.mxu0 %v3029_v9 }
 0x942   : > { %2875 = vmatpush3.msra.mxu0 %v2666_v61 }
 0x943   : > { %2876 = vmatprep.subr.mxu0 %v3029_v9 }
 0x944   : > { %2877 = vmatpush3.msra.mxu0 %v2665_v62 }
 0x945   : > { %2881 = vmatprep.subr.mxu0 %v3029_v9 }
 0x9fd   : > { %v1419_v40 = vpop.f32.mrf.mxu0 }
 0x9fe   : > { %v1420_v41 = vadd.f32 %v2659_v39, %v1419_v40 }
 0x9ff   : > { %v2850_v42 = vpop.f32.mrf.mxu0 }
 0xa00   : > { %v1424_v43 = vmul.f32 0.70710677, %v1420_v41  ;;  %v1423_v45 = vmul.f32 0.5, %v1420_v41 }
 0xa02   : > { %2997 = verf.f32 %v1424_v43 }
 0xa0f   : > { %v2998_v44 = vpop.eup %2997 }
 0xa10   : > { %v1426_v46 = vadd.f32 1.0, %v2998_v44  ;;  %v2673_v44 = vld [vmem:[%s3592_s25 + $0x28] sm:$0xff] }
 0xa12   : > { %v1427_v47 = vmul.f32 %v1426_v46, %v1423_v45  ;;  %v2672_v45 = vld [vmem:[%s3592_s25 + $0x20] sm:$0xff]  ;;  %v2675_v46 = vld [vmem:[%s3592_s25 + $0x38] sm:$0xff] }
 0xa14   : > { %2868 = vmatmul.mubr.msk.f32.vlgmr.msra.gmra.mxu1 %vm1443_vm4, %v1427_v47  ;;  %v2674_v47 = vld [vmem:[%s3592_s25 + $0x30] sm:$0xff] }
 0xa15   : > { %2888 = vmatprep.mubr.msk.f32.mxu1 %vm3030_vm1, %v3029_v9 }
 0xad4   : > { %v1513_v49 = vpop.f32.mrf.mxu1 }
 0xad5   : > { %v1514_v50 = vadd.f32 %v2661_v48, %v1513_v49 }
 0xad6   : > { %v2869_v51 = vpop.f32.mrf.mxu1 }
 0xad7   : > { %v1517_v52 = vadd.f32 %v1514_v50, %v1338_v30 }
 0xad9   : > { %v1520_v53 = vsel %vm696_vm0, %v1517_v52, 0.0 }
 0xada   : > { %1521 = vadd.xlane.f32.xlu0 %v1520_v53 }
 0xb63   : > { %v1522_v54 = vpop.xlane.xlu0 %1521 }
 0xb64   : > { %v1523_v55 = vmul.f32 0.03125, %v1522_v54 }
 0xb66   : > { %v1524_v56 = vsub.f32 %v1517_v52, %v1523_v55  ;;  %v2685_v55 = vld [vmem:[%s3558_s7 + $0x1] ss:$0 sm:$0xff] }
 0xb68   : > { %v1525_v57 = vmul.f32 %v1524_v56, %v1524_v56 }
 0xb6a   : > { %v1526_v58 = vsel %vm696_vm0, %v1525_v57, 0.0 }
 0xb6b   : > { %1527 = vadd.xlane.f32.xlu0 %v1526_v58 }
 0xbf4   : > { %v1528_v63 = vpop.xlane.xlu0 %1527 }
 0xbf5   : > { %v1529_v0 = vmul.f32 0.03125, %v1528_v63 }
 0xbf7   : > { %v1530_v1 = vadd.f32 1e-12, %v1529_v0 }
 0xbf9   : > { %2999 = vrsqrt.f32 %v1530_v1 }
 0xc06   : > { %v3000_v2 = vpop.eup %2999 }
 0xc07   : > { %v1532_v4 = vmul.f32 %v3000_v2, %v1524_v56  ;;  %v2693_v2 = vld [vmem:[%s3561_s10 + $0x38] sm:$0xff] }
 0xc09   : > { %v1539_v6 = vmul.f32 %v2663_v3, %v1532_v4  ;;  %v2692_v3 = vld [vmem:[%s3561_s10 + $0x30] sm:$0xff]  ;;  %v2691_v4 = vld [vmem:[%s3561_s10 + $0x28] sm:$0xff] }
 0xc0b   : > { %v3361_v7 = vadd.f32 %v2664_v5, %v1539_v6  ;;  %v2690_v5 = vld [vmem:[%s3561_s10 + $0x20] sm:$0xff] }
 0xc0d   : > { %2879 = vmatmul.mubr.msk.f32.vlgmr.msra.gmra.mxu0 %vm696_vm0, %v3361_v7 }
 0xc0e   : > { %2883 = vmatprep.mubr.msk.f32.mxu0 %vm3030_vm1, %v3029_v9 }
 0xccd   : > { %v1629_v10 = vpop.f32.mrf.mxu0 }
 0xcce   : > { %v1630_v11 = vadd.f32 %v2670_v8, %v1629_v10 }
 0xccf   : > { %v2880_v12 = vpop.f32.mrf.mxu0 }
 0xcd0   : > { %1806 = vrot.lane.b32.xlu1 %v1630_v11, %s3033_s0  ;;  %1639 = vrot.lane.b32.xlu0 %v1630_v11, %s3032_s27  ;;  %s3593_s27 = smov 48   ;;  %s3594_s0 = smov 64  }
 0xcd4   : > { %1804 = vrot.lane.b32.xlu0 %v1630_v11, %s3034_s23 }
 0xd42   : > { %v1640_v13 = vpop.permute.xlu0 %1639  ;;  %v1807_v14 = vpop.permute.xlu1 %1806 }
 0xd43   : > { %2882 = vmatpush3.xpose.msk.msra.mxu0 %vm817_vm2, %v1640_v13  ;;  %v2689_v13 = vld [vmem:[%s3560_s9 + $0x1] ss:$0 sm:$0xff] }
 0xd44   : > { %2891 = vmatprep.subr.mxu0 %v3029_v9 }
 0xd46   : > { %2884 = vmatmul.mubr.msk.f32.vlgmr.msra.gmra.mxu0 %vm817_vm2, %v1630_v11  ;;  %v1805_v15 = vpop.permute.xlu0 %1804 }
 0xd47   : > { %2892 = vmatpush3.xpose.msk.msra.mxu0 %vm817_vm2, %v1807_v14  ;;  %2893 = vmatprep.mubr.msk.f32.mxu0 %vm3030_vm1, %v3029_v9 }
 0xd48   : > { %2901 = vmatprep.subr.mxu0 %v3029_v9 }
 0xd4a   : > { %2894 = vmatmul.mubr.msk.f32.vlgmr.msra.gmra.mxu0 %vm817_vm2, %v1805_v15 }
 0xd4b   : > { %2905 = vmatprep.mubr.msk.f32.mxu0 %vm3030_vm1, %v3029_v9  ;;  %2902 = vmatpush3.msra.mxu0 %v2675_v46  ;;  %v2372_v46 = vld [vmem:[%s3567_s16 + $0x8] sm:$0xff] }
 0xd4c   : > { %2903 = vmatprep.subr.mxu0 %v3029_v9 }
 0xd4d   : > { %2904 = vmatpush3.msra.mxu0 %v2674_v47  ;;  %v2371_v47 = vld [vmem:[%s3567_s16] sm:$0xff] }
 0xd4e   : > { %2915 = vmatprep.subr.mxu0 %v3029_v9 }
 0xe06   : > { %v1711_v16 = vpop.f32.mrf.mxu0 }
 0xe07   : > { %v1715_v17 = vmul.f32 0.25, %v1711_v16  ;;  %v2704_v16 = vld [vmem:[%s3563_s12 + $0x78] sm:$0xff] }
 0xe08   : > { %v2885_v18 = vpop.f32.mrf.mxu0 }
 0xe09   : > { %v1716_v19 = vadd.f32 %v3220_v29, %v1715_v17  ;;  %v2703_v17 = vld [vmem:[%s3563_s12 + $0x70] sm:$0xff]  ;;  %v2702_v18 = vld [vmem:[%s3563_s12 + $0x68] sm:$0xff] }
 0xe0a   : > { %v1878_v20 = vpop.f32.mrf.mxu0 }
 0xe0b   : > { %v1882_v21 = vmul.f32 0.25, %v1878_v20  ;;  %v1717_v22 = vsel %vm900_vm3, %v1716_v19, -inf  ;;  %v2700_v20 = vld [vmem:[%s3563_s12 + $0x58] sm:$0xff] }
 0xe0c   : > { %1718 = vmax.xlane.f32.xlu0 %v1717_v22  ;;  %v2895_v23 = vpop.f32.mrf.mxu0  ;;  %v2698_v22 = vld [vmem:[%s3563_s12 + $0x48] sm:$0xff] }
 0xe0d   : > { %v1883_v24 = vadd.f32 %v3220_v29, %v1882_v21  ;;  %v2699_v21 = vld [vmem:[%s3563_s12 + $0x50] sm:$0xff]  ;;  %v2697_v23 = vld [vmem:[%s3563_s12 + $0x40] sm:$0xff] }
 0xe0f   : > { %v1884_v25 = vsel %vm900_vm3, %v1883_v24, -inf }
 0xe10   : > { %1885 = vmax.xlane.f32.xlu1 %v1884_v25 }
 0xe21   : > { %1895 = vrot.lane.b32.xlu1 %v1630_v11, %s3593_s27 }
 0xe95   : > { %v1719_v26 = vpop.xlane.xlu0 %1718 }
 0xe96   : > { %v1720_v27 = vsub.f32 %v1716_v19, %v1719_v26  ;;  %v2701_v19 = vld [vmem:[%s3563_s12 + $0x60] sm:$0xff] }
 0xe98   : > { %v1721_v28 = vmul.f32 1.442695, %v1720_v27 }
 0xe99   : > { %v1886_v30 = vpop.xlane.xlu1 %1885 }
 0xe9a   : > { %3001 = vpow2.f32 %v1721_v28  ;;  %v1887_v31 = vsub.f32 %v1883_v24, %v1886_v30  ;;  %v2695_v24 = vld [vmem:[%s3562_s11 + $0x1] ss:$0 sm:$0xff] }
 0xe9c   : > { %v1888_v32 = vmul.f32 1.442695, %v1887_v31 }
 0xe9d   : > { %v1896_v41 = vpop.permute.xlu1 %1895 }
 0xe9e   : > { %3003 = vpow2.f32 %v1888_v32 }
 0xea7   : > { %v3002_v33 = vpop.eup %3001 }
 0xea8   : > { %v1723_v34 = vsel %vm900_vm3, %v3002_v33, 0.0 }
 0xea9   : > { %1724 = vadd.xlane.f32.xlu0 %v1723_v34  ;;  %v2706_v34 = vld [vmem:[%s3564_s13 + $0x1] ss:$0 sm:$0xff] }
 0xeab   : > { %v3004_v35 = vpop.eup %3003 }
 0xeac   : > { %v1890_v29 = vsel %vm900_vm3, %v3004_v35, 0.0 }
 0xead   : > { %1891 = vadd.xlane.f32.xlu0 %v1890_v29 }
 0xec3   : > { %1728 = vrot.lane.b32.xlu0 %v1630_v11, %s3594_s0  ;;  %v2688_v11 = vld [vmem:[%s3559_s8 + $0x1] ss:$0 sm:$0xff] }
 0xf32   : > { %v1725_v36 = vpop.xlane.xlu0 %1724 }
 0xf33   : > { %3005 = vrcp.f32 %v1725_v36 }
 0xf36   : > { %v1892_v37 = vpop.xlane.xlu0 %1891 }
 0xf37   : > { %3007 = vrcp.f32 %v1892_v37 }
 0xf3a   : > { %v1729_v38 = vpop.permute.xlu0 %1728 }
 0xf3b   : > { %2887 = vmatpush3.msra.mxu1 %v1729_v38 }
 0xf3c   : > { %2896 = vmatprep.subr.mxu1 %v3029_v9 }
 0xf40   : > { %v3006_v39 = vpop.eup %3005 }
 0xf41   : > { %v1727_v40 = vmul.f32 %v3006_v39, %v3002_v33 }
 0xf43   : > { %2889 = vmatmul.mubr.msk.f32.vlgmr.msra.gmra.mxu1 %vm900_vm3, %v1727_v40 }
 0xf44   : > { %v3008_v42 = vpop.eup %3007  ;;  %2897 = vmatpush3.msra.mxu1 %v1896_v41  ;;  %2898 = vmatprep.mubr.msk.f32.mxu1 %vm3030_vm1, %v3029_v9 }
 0xf45   : > { %v1894_v43 = vmul.f32 %v3008_v42, %v3004_v35  ;;  %2908 = vmatprep.subr.mxu1 %v3029_v9 }
 0xf47   : > { %2899 = vmatmul.mubr.msk.f32.vlgmr.msra.gmra.mxu1 %vm900_vm3, %v1894_v43 }
 0xf48   : > { %2909 = vmatpush3.msra.mxu1 %v2673_v44  ;;  %2912 = vmatprep.mubr.msk.f32.mxu1 %vm3030_vm1, %v3029_v9  ;;  %v2374_v44 = vld [vmem:[%s3567_s16 + $0x18] sm:$0xff] }
 0xf49   : > { %2910 = vmatprep.subr.mxu1 %v3029_v9 }
 0xf4a   : > { %2911 = vmatpush3.msra.mxu1 %v2672_v45  ;;  %v2373_v45 = vld [vmem:[%s3567_s16 + $0x10] sm:$0xff] }
 0xf4b   : > { %2926 = vmatprep.subr.mxu1 %v3029_v9 }
0x1003   : > { %v1800_v48 = vpop.f32.mrf.mxu1 }
0x1004   : > { %2913 = vmatmul.mubr.msk.f32.vlgmr.msra.gmra.mxu1 %vm817_vm2, %v1800_v48 }
0x1005   : > { %v2890_v49 = vpop.f32.mrf.mxu1  ;;  %2942 = vmatprep.mubr.msk.f32.mxu1 %vm3030_vm1, %v3029_v9  ;;  %2927 = vmatpush3.msra.mxu1 %v2704_v16 }
0x1006   : > { %2928 = vmatprep.subr.mxu1 %v3029_v9 }
0x1007   : > { %v1967_v50 = vpop.f32.mrf.mxu1  ;;  %2929 = vmatpush3.msra.mxu1 %v2703_v17 }
0x1008   : > { %2906 = vmatmul.mubr.msk.f32.vlgmr.msra.gmra.mxu0 %vm817_vm2, %v1967_v50  ;;  %2930 = vmatprep.subr.mxu1 %v3029_v9 }
0x1009   : > { %v2900_v51 = vpop.f32.mrf.mxu1  ;;  %2923 = vmatprep.mubr.msk.f32.mxu0 %vm3030_vm1, %v3029_v9  ;;  %2916 = vmatpush3.msra.mxu0 %v2693_v2  ;;  %v2715_v2 = vld [vmem:[#allocation2] ss:$0 sm:$0xff] }
0x100a   : > { %2917 = vmatprep.subr.mxu0 %v3029_v9  ;;  %2931 = vmatpush3.msra.mxu1 %v2702_v18  ;;  %v2504_v18 = vld [vmem:[%s3571_s20 + $0x18] sm:$0xff] }
0x100b   : > { %2918 = vmatpush3.msra.mxu0 %v2692_v3  ;;  %2932 = vmatprep.subr.mxu1 %v3029_v9 }
0x100c   : > { %2919 = vmatprep.subr.mxu0 %v3029_v9  ;;  %2933 = vmatpush3.msra.mxu1 %v2701_v19  ;;  %v2503_v19 = vld [vmem:[%s3571_s20 + $0x10] sm:$0xff] }
0x100d   : > { %2920 = vmatpush3.msra.mxu0 %v2691_v4  ;;  %2934 = vmatprep.subr.mxu1 %v3029_v9 }
0x100e   : > { %2921 = vmatprep.subr.mxu0 %v3029_v9  ;;  %2935 = vmatpush3.msra.mxu1 %v2700_v20  ;;  %v2502_v20 = vld [vmem:[%s3571_s20 + $0x8] sm:$0xff] }
0x100f   : > { %2922 = vmatpush3.msra.mxu0 %v2690_v5  ;;  %2936 = vmatprep.subr.mxu1 %v3029_v9 }
0x1010   : > { %2945 = vmatprep.subr.mxu0 %v3029_v9  ;;  %2937 = vmatpush3.msra.mxu1 %v2699_v21  ;;  %v2501_v21 = vld [vmem:[%s3571_s20] sm:$0xff] }
0x1011   : > { %2938 = vmatprep.subr.mxu1 %v3029_v9 }
0x1012   : > { %2939 = vmatpush3.msra.mxu1 %v2698_v22 }
0x1013   : > { %2940 = vmatprep.subr.mxu1 %v3029_v9 }
0x1014   : > { %2941 = vmatpush3.msra.mxu1 %v2697_v23 }
0x10c4   : > { %v2113_v52 = vpop.f32.mrf.mxu1 }
0x10c6   : > { %v2914_v53 = vpop.f32.mrf.mxu1 }
0x10c8   : > { %v2040_v54 = vpop.f32.mrf.mxu0 }
0x10c9   : > { %v2114_v56 = vadd.f32 %v2113_v52, %v2040_v54  ;;  %v2710_v52 = vld [vmem:[%s3565_s14 + $0x1] ss:$0 sm:$0xff] }
0x10ca   : > { %v2907_v57 = vpop.f32.mrf.mxu0  ;;  %v2711_v54 = vld [vmem:[%s3566_s15 + $0x1] ss:$0 sm:$0xff] }
0x10cb   : > { %v2125_v58 = vadd.f32 %v2685_v55, %v2114_v56  ;;  %v2712_v57 = vld [vmem:[%s3568_s17] ss:$0 sm:$0xff] }
0x10cd   : > { %v2126_v59 = vadd.f32 %v2125_v58, %v3361_v7 }
0x10cf   : > { %v2131_v60 = vsel %vm696_vm0, %v2126_v59, 0.0 }
0x10d0   : > { %2132 = vadd.xlane.f32.xlu1 %v2131_v60 }
0x1159   : > { %v2133_v61 = vpop.xlane.xlu1 %2132 }
0x115a   : > { %v2134_v62 = vmul.f32 0.03125, %v2133_v61  ;;  %v2714_v61 = vld [vmem:[%s3569_s18] ss:$0 sm:$0xff] }
0x115c   : > { %v2135_v63 = vsub.f32 %v2126_v59, %v2134_v62 }
0x115e   : > { %v2136_v0 = vmul.f32 %v2135_v63, %v2135_v63 }
0x1160   : > { %v2137_v1 = vsel %vm696_vm0, %v2136_v0, 0.0 }
0x1161   : > { %2138 = vadd.xlane.f32.xlu0 %v2137_v1  ;;  %v3036_v1 = vmov 0  }
0x1162   : > { %2983 = vset.pattern.permute.xlu1 %v3036_v1  ;;  %2984 = vset.pattern.permute.xlu0 %v3036_v1 }
0x11ea   : > { %v2139_v6 = vpop.xlane.xlu0 %2138 }
0x11eb   : > { %v2140_v7 = vmul.f32 0.03125, %v2139_v6 }
0x11ed   : > { %v2141_v8 = vadd.f32 1e-12, %v2140_v7 }
0x11ef   : > { %3009 = vrsqrt.f32 %v2141_v8 }
0x11fc   : > { %v3010_v10 = vpop.eup %3009 }
0x11fd   : > { %v2143_v12 = vmul.f32 %v3010_v10, %v2135_v63 }
0x11ff   : > { %v2150_v14 = vmul.f32 %v2688_v11, %v2143_v12 }
0x1201   : > { %v2157_v15 = vadd.f32 %v2689_v13, %v2150_v14 }
0x1203   : > { %2924 = vmatmul.mubr.msk.f32.vlgmr.msra.gmra.mxu0 %vm696_vm0, %v2157_v15 }
0x1204   : > { %2953 = vmatprep.mubr.msk.f32.mxu0 %vm3030_vm1, %v3029_v9  ;;  %2946 = vmatpush3.msra.mxu0 %v2374_v44 }
0x1205   : > { %2947 = vmatprep.subr.mxu0 %v3029_v9 }
0x1206   : > { %2948 = vmatpush3.msra.mxu0 %v2373_v45 }
0x1207   : > { %2949 = vmatprep.subr.mxu0 %v3029_v9 }
0x1208   : > { %2950 = vmatpush3.msra.mxu0 %v2372_v46 }
0x1209   : > { %2951 = vmatprep.subr.mxu0 %v3029_v9 }
0x120a   : > { %2952 = vmatpush3.msra.mxu0 %v2371_v47 }
0x120b   : > { %2956 = vmatprep.subr.mxu0 %v3029_v9 }
0x12c3   : > { %v2240_v25 = vpop.f32.mrf.mxu0 }
0x12c4   : > { %v2241_v26 = vadd.f32 %v2695_v24, %v2240_v25 }
0x12c5   : > { %v2925_v27 = vpop.f32.mrf.mxu0 }
0x12c6   : > { %v2245_v28 = vmul.f32 0.70710677, %v2241_v26  ;;  %v2244_v31 = vmul.f32 0.5, %v2241_v26 }
0x12c8   : > { %3011 = verf.f32 %v2245_v28 }
0x12d5   : > { %v3012_v30 = vpop.eup %3011 }
0x12d6   : > { %v2247_v32 = vadd.f32 1.0, %v3012_v30 }
0x12d8   : > { %v2248_v33 = vmul.f32 %v2247_v32, %v2244_v31  ;;  %v2505_v32 = vld [vmem:[%s3572_s21] sm:$0x1] }
0x12da   : > { %2943 = vmatmul.mubr.msk.f32.vlgmr.msra.gmra.mxu1 %vm1443_vm4, %v2248_v33 }
0x139a   : > { %v2335_v35 = vpop.f32.mrf.mxu1 }
0x139b   : > { %v2336_v29 = vadd.f32 %v2706_v34, %v2335_v35 }
0x139c   : > { %v2944_v36 = vpop.f32.mrf.mxu1 }
0x139d   : > { %v2339_v37 = vadd.f32 %v2336_v29, %v2157_v15 }
0x139f   : > { %v2344_v38 = vsel %vm696_vm0, %v2339_v37, 0.0 }
0x13a0   : > { %2345 = vadd.xlane.f32.xlu0 %v2344_v38 }
0x1429   : > { %v2346_v39 = vpop.xlane.xlu0 %2345 }
0x142a   : > { %v2347_v40 = vmul.f32 0.03125, %v2346_v39 }
0x142c   : > { %v2348_v41 = vsub.f32 %v2339_v37, %v2347_v40 }
0x142e   : > { %v2349_v42 = vmul.f32 %v2348_v41, %v2348_v41 }
0x1430   : > { %v2350_v43 = vsel %vm696_vm0, %v2349_v42, 0.0 }
0x1431   : > { %2351 = vadd.xlane.f32.xlu1 %v2350_v43 }
0x14ba   : > { %v2352_v48 = vpop.xlane.xlu1 %2351 }
0x14bb   : > { %v2353_v49 = vmul.f32 0.03125, %v2352_v48 }
0x14bd   : > { %v2354_v50 = vadd.f32 1e-12, %v2353_v49 }
0x14bf   : > { %3013 = vrsqrt.f32 %v2354_v50 }
0x14cc   : > { %v3014_v51 = vpop.eup %3013 }
0x14cd   : > { %v2356_v53 = vmul.f32 %v3014_v51, %v2348_v41 }
0x14cf   : > { %v2363_v55 = vmul.f32 %v2710_v52, %v2356_v53 }
0x14d1   : > { %v2370_v56 = vadd.f32 %v2711_v54, %v2363_v55 }
0x14d3   : > { %2954 = vmatmul.mubr.msk.f32.vlgmr.msra.gmra.mxu0 %vm696_vm0, %v2370_v56 }
0x14d4   : > { %2964 = vmatprep.mubr.msk.f32.mxu0 %vm3030_vm1, %v3029_v9  ;;  %2957 = vmatpush3.msra.mxu0 %v2504_v18 }
0x14d5   : > { %2958 = vmatprep.subr.mxu0 %v3029_v9 }
0x14d6   : > { %2959 = vmatpush3.msra.mxu0 %v2503_v19 }
0x14d7   : > { %2960 = vmatprep.subr.mxu0 %v3029_v9 }
0x14d8   : > { %2961 = vmatpush3.msra.mxu0 %v2502_v20 }
0x14d9   : > { %2962 = vmatprep.subr.mxu0 %v3029_v9 }
0x14da   : > { %2963 = vmatpush3.msra.mxu0 %v2501_v21 }
0x1593   : > { %v2451_v58 = vpop.f32.mrf.mxu0 }
0x1594   : > { %v2452_v59 = vadd.f32 %v2712_v57, %v2451_v58 }
0x1595   : > { %v2955_v60 = vpop.f32.mrf.mxu0 }
0x1596   : > { %3015 = vtanh.f32 %v2452_v59 }
0x15a3   : > { %v3016_v62 = vpop.eup %3015 }
0x15a4   : > { %v2463_v63 = vmul.f32 %v3016_v62, %v2714_v61 }
0x15a6   : > { %v2464_v0 = vsel %vm817_vm2, %v2463_v63, 0.0 }
0x15a7   : > { %2465 = vadd.xlane.f32.xlu0 %v2464_v0 }
0x1630   : > { %v2466_v3 = vpop.xlane.xlu0 %2465 }
0x1631   : > { %v2474_v4 = vadd.f32 %v2715_v2, %v2466_v3 }
0x1633   : > { %v2475_v5 = vmul.f32 1.442695, %v2474_v4 }
0x1635   : > { %3017 = vpow2.f32 %v2475_v5 }
0x1642   : > { %v3018_v6 = vpop.eup %3017 }
0x1643   : > { %v2478_v7 = vsel %vm2477_vm5, %v3018_v6, 0.0 }
0x1644   : > { %v2479_v8 = vrot.slane %v2478_v7, 4 }
0x1646   : > { %v2480_v10 = vadd.f32 %v2479_v8, %v2478_v7 }
0x1648   : > { %v2481_v11 = vrot.slane %v2480_v10, 2 }
0x164a   : > { %v2482_v12 = vadd.f32 %v2481_v11, %v2480_v10 }
0x164c   : > { %v2483_v13 = vrot.slane %v2482_v12, 1 }
0x164e   : > { %v2484_v14 = vadd.f32 %v2483_v13, %v2482_v12 }
0x1650   : > { %v2485_v15 = vadd.f32 1e-08, %v2484_v14 }
0x1652   : > { %3019 = vrcp.f32 %v2485_v15 }
0x165f   : > { %v3020_v16 = vpop.eup %3019 }
0x1660   : > { %v2487_v17 = vmul.f32 %v3020_v16, %v3018_v6 }
0x1662   : > { %2490 = vperm.xlu1 %2983, %v2487_v17  }
0x16dd   : > { %v2491_v22 = vpop.permute.xlu1 %2490 }
0x16de   : > { %v2493_v23 = vmul.f32 %v2491_v22, %v2370_v56 }
0x16e0   : > { %v2494_v24 = vsel %vm696_vm0, %v2493_v23, 0.0 }
0x16e1   : > { %v2495_v25 = vrot.slane %v2494_v24, 4 }
0x16e3   : > { %v2496_v26 = vadd.f32 %v2495_v25, %v2494_v24 }
0x16e5   : > { %v2497_v27 = vrot.slane %v2496_v26, 2 }
0x16e7   : > { %v2498_v28 = vadd.f32 %v2497_v27, %v2496_v26 }
0x16e9   : > { %v2499_v30 = vrot.slane %v2498_v28, 1 }
0x16eb   : > { %v2500_v31 = vadd.f32 %v2499_v30, %v2498_v28 }
0x16ed   : > { %2965 = vmatmul.mubr.msk.f32.vlgmr.msra.gmra.mxu0 %vm696_vm0, %v2500_v31 }
0x17ad   : > { %v2575_v9 = vpop.f32.mrf.mxu0 }
0x17ae   : > { %v2576_v33 = vadd.f32 %v2575_v9, %v2505_v32 }
0x17af   : > { %v2966_v34 = vpop.f32.mrf.mxu0 }
0x17b0   : > { %2580 = vst.msk [vmem:[%s692_s4] sm:$0x1] %vm2579_vm6, %v2576_v33 }
0x17b1 PF: > { %s34_s29 = sadd.s32 1, %s3027_s29  }
0x17b2   : > { %p31_p4 = scmp.ge.s32.totalorder %s34_s29, 16  }
0x17b4   :  { %33 = sbr.rel (!%p31_p4) target bundleno = 8 (0x8), region = 153 }

</bundles_post_ra>
